<compile_context>
chip_gen: v6e
topology: v6e:2x2x1
jax: 0.10.0
libtpu: 0.0.40
codegen_flags: <defaults>
</compile_context>

<pallas_src>
import math
from functools import partial

import jax
import jax.numpy as jnp
from jax.experimental import pallas as pl
from jax.experimental.pallas import tpu as pltpu

_VMEM = pl.BlockSpec(memory_space=pltpu.MemorySpace.VMEM)

_PER_LAYER = 12  # wqkv, bqkv, wo, bo, ln1g, ln1b, wff1, bff1, wff2, bff2, ln2g, ln2b


# -----------------------------------------------------------------------------
# Single fused Pallas kernel: emb-LN -> N encoder layers -> pooler -> classifier
# -----------------------------------------------------------------------------
def _bert_fused_kernel(*refs, B, S, heads, dh, n_layers, eps):
    n_in = 4 + _PER_LAYER * n_layers + 4
    in_refs = refs[:n_in]
    o_ref = refs[n_in]           # (B, num_labels) logits
    ctx_ref = refs[n_in + 1]     # (B*S, H) f32 scratch for per-head context assembly

    emb_ref, mask_ref, eg_ref, eb_ref = in_refs[:4]
    wp_ref, bp_ref, wc_ref, bc_ref = in_refs[4 + _PER_LAYER * n_layers:]

    H = heads * dh
    M = B * S

    def layer_norm(h, g, b):
        mu = jnp.mean(h, axis=-1, keepdims=True)
        hc = h - mu
        var = jnp.mean(hc * hc, axis=-1, keepdims=True)
        return hc * jax.lax.rsqrt(var + eps) * g + b

    # ---- embedding LayerNorm (f32) ----
    x = layer_norm(emb_ref[...], eg_ref[...], eb_ref[...])          # (M, H)
    mask_b = mask_ref[...][:, None, :]                               # (B, 1, S) additive

    for l in range(n_layers):
        (wqkv_ref, bqkv_ref, wo_ref, bo_ref, ln1g_ref, ln1b_ref,
         wff1_ref, bff1_ref, wff2_ref, bff2_ref, ln2g_ref, ln2b_ref) = \
            in_refs[4 + l * _PER_LAYER: 4 + (l + 1) * _PER_LAYER]

        # ---- fused QKV projection: one bf16 MXU matmul, f32 accumulate ----
        # (1/sqrt(dh) is pre-folded into the Q columns of wqkv/bqkv by the wrapper)
        qkv = jnp.dot(x.astype(jnp.bfloat16), wqkv_ref[...],
                      preferred_element_type=jnp.float32) + bqkv_ref[...]   # (M, 3H)

        # ---- self-attention: batched over B per head; results go to VMEM scratch ----
        for h in range(heads):
            q = qkv[:, h * dh:(h + 1) * dh].reshape(B, S, dh)
            k = qkv[:, H + h * dh:H + (h + 1) * dh].reshape(B, S, dh)
            v = qkv[:, 2 * H + h * dh:2 * H + (h + 1) * dh].reshape(B, S, dh)
            s = jnp.einsum('bqd,bkd->bqk', q, k,
                           preferred_element_type=jnp.float32) + mask_b     # (B, S, S)
            s = s - jnp.max(s, axis=-1, keepdims=True)
            p = jnp.exp(s)
            p = p * pl.reciprocal(jnp.sum(p, axis=-1, keepdims=True), approx=True)
            ctx_h = jnp.einsum('bqk,bkd->bqd', p, v,
                               preferred_element_type=jnp.float32)          # (B, S, dh)
            ctx_ref[:, h * dh:(h + 1) * dh] = ctx_h.reshape(M, dh)

        # ---- attention output projection + residual + LayerNorm1 ----
        attn = jnp.dot(ctx_ref[...].astype(jnp.bfloat16), wo_ref[...],
                       preferred_element_type=jnp.float32) + bo_ref[...]
        x = layer_norm(attn + x, ln1g_ref[...], ln1b_ref[...])

        # ---- FFN (exact erf-GELU, matching HF "gelu") + residual + LayerNorm2 ----
        ff = jnp.dot(x.astype(jnp.bfloat16), wff1_ref[...],
                     preferred_element_type=jnp.float32) + bff1_ref[...]
        ff = 0.5 * ff * (1.0 + jax.lax.erf(ff * (1.0 / math.sqrt(2.0))))
        ff = jnp.dot(ff.astype(jnp.bfloat16), wff2_ref[...],
                     preferred_element_type=jnp.float32) + bff2_ref[...]
        x = layer_norm(ff + x, ln2g_ref[...], ln2b_ref[...])

    # ---- pooler (CLS rows, tanh) + dropout(eval=identity) + classifier ----
    # TODO(synk): training-mode stochastic dropout (p=0.1, pltpu.prng_*) not applied; eval semantics.
    cls = x.reshape(B, S, H)[:, 0, :]                                       # (B, H)
    pooled = jnp.tanh(jnp.dot(cls.astype(jnp.bfloat16), wp_ref[...],
                              preferred_element_type=jnp.float32) + bp_ref[...])
    o_ref[...] = (jnp.dot(pooled.astype(jnp.bfloat16), wc_ref[...],
                          preferred_element_type=jnp.float32) + bc_ref[...]).astype(o_ref.dtype)


# -----------------------------------------------------------------------------
# Model glue (embedding gathers, param prep) in plain JAX
# -----------------------------------------------------------------------------
def init_params(key, *, vocab, hidden, layers, heads, inter, max_pos, type_vocab, num_labels):
    keys = iter(jax.random.split(key, 64))
    std = 0.02

    def dense(kin, kout):
        return {"w": jax.random.normal(next(keys), (kin, kout), jnp.float32) * std,
                "b": jnp.zeros((kout,), jnp.float32)}

    p = {
        "word_emb": jax.random.normal(next(keys), (vocab, hidden), jnp.float32) * std,
        "pos_emb": jax.random.normal(next(keys), (max_pos, hidden), jnp.float32) * std,
        "type_emb": jax.random.normal(next(keys), (type_vocab, hidden), jnp.float32) * std,
        "emb_ln_g": jnp.ones((hidden,), jnp.float32),
        "emb_ln_b": jnp.zeros((hidden,), jnp.float32),
        "layers": [],
        "pooler": dense(hidden, hidden),
        "classifier": dense(hidden, num_labels),
    }
    for _ in range(layers):
        p["layers"].append({
            "qkv": dense(hidden, 3 * hidden),        # fused W_q | W_k | W_v
            "attn_out": dense(hidden, hidden),
            "ln1_g": jnp.ones((hidden,), jnp.float32), "ln1_b": jnp.zeros((hidden,), jnp.float32),
            "ffn_in": dense(hidden, inter), "ffn_out": dense(inter, hidden),
            "ln2_g": jnp.ones((hidden,), jnp.float32), "ln2_b": jnp.zeros((hidden,), jnp.float32),
        })
    return p


def my_model_forward(params, input_ids, attention_mask, labels=None, *, heads):
    B, S = input_ids.shape
    H = params["word_emb"].shape[1]
    dh = H // heads
    n_layers = len(params["layers"])
    L = params["classifier"]["w"].shape[1]

    # --- embeddings (gathers are glue; token_type_ids == 0) ---
    emb = (params["word_emb"][input_ids]
           + params["pos_emb"][jnp.arange(S)][None, :, :]
           + params["type_emb"][0][None, None, :]).reshape(B * S, H)

    # additive attention mask: (B, S), 0 for real tokens, -10000 for padding
    add_mask = (1.0 - attention_mask.astype(jnp.float32)) * -10000.0

    # fold 1/sqrt(dh) into the Q columns of the fused QKV weight/bias
    qcol = jnp.concatenate([jnp.full((H,), 1.0 / math.sqrt(dh), jnp.float32),
                            jnp.ones((2 * H,), jnp.float32)])

    args = [emb, add_mask,
            params["emb_ln_g"].reshape(1, H), params["emb_ln_b"].reshape(1, H)]
    for lyr in params["layers"]:
        args += [
            (lyr["qkv"]["w"] * qcol[None, :]).astype(jnp.bfloat16),
            (lyr["qkv"]["b"] * qcol).reshape(1, -1),
            lyr["attn_out"]["w"].astype(jnp.bfloat16), lyr["attn_out"]["b"].reshape(1, -1),
            lyr["ln1_g"].reshape(1, -1), lyr["ln1_b"].reshape(1, -1),
            lyr["ffn_in"]["w"].astype(jnp.bfloat16), lyr["ffn_in"]["b"].reshape(1, -1),
            lyr["ffn_out"]["w"].astype(jnp.bfloat16), lyr["ffn_out"]["b"].reshape(1, -1),
            lyr["ln2_g"].reshape(1, -1), lyr["ln2_b"].reshape(1, -1),
        ]
    args += [params["pooler"]["w"].astype(jnp.bfloat16), params["pooler"]["b"].reshape(1, H),
             params["classifier"]["w"].astype(jnp.bfloat16), params["classifier"]["b"].reshape(1, L)]

    logits = pl.pallas_call(
        partial(_bert_fused_kernel, B=B, S=S, heads=heads, dh=dh, n_layers=n_layers, eps=1e-12),
        out_shape=jax.ShapeDtypeStruct((B, L), jnp.float32),
        in_specs=[_VMEM] * len(args),
        out_specs=_VMEM,
        scratch_shapes=[pltpu.VMEM((B * S, H), jnp.float32)],
    )(*args)

    if labels is not None:
        logp = jax.nn.log_softmax(logits, axis=-1)
        loss = -jnp.mean(jnp.take_along_axis(logp, labels[:, None], axis=-1))
        return logits, loss
    return logits


# -----------------------------------------------------------------------------
if __name__ == "__main__":
    VOCAB, HIDDEN, LAYERS, HEADS = 100, 32, 2, 4
    INTER, MAX_POS, TYPE_VOCAB, NUM_LABELS = 64, 16, 2, 3
    B, S = 2, 8

    key = jax.random.PRNGKey(0)
    pkey, ikey = jax.random.split(key)
    params = init_params(pkey, vocab=VOCAB, hidden=HIDDEN, layers=LAYERS, heads=HEADS,
                         inter=INTER, max_pos=MAX_POS, type_vocab=TYPE_VOCAB,
                         num_labels=NUM_LABELS)

    input_ids = jax.random.randint(ikey, (B, S), 0, VOCAB, dtype=jnp.int32)
    attention_mask = jnp.ones((B, S), jnp.int32).at[1, 6:].set(0)   # pad tail of 2nd sequence
    labels = jnp.array([0, 2], jnp.int32)

    logits = my_model_forward(params, input_ids, attention_mask, heads=HEADS)
    logits_l, loss = my_model_forward(params, input_ids, attention_mask, labels, heads=HEADS)

    jax.block_until_ready((logits, logits_l, loss))
    assert logits.shape == (B, NUM_LABELS)
    print("KERNEL_OK")
</pallas_src>

<mosaic_0001>
module attributes {stable_mosaic.version = 11 : i64} {
  func.func @_bert_fused_kernel(%arg0: memref<16x32xf32, #tpu.memory_space<vmem>>, %arg1: memref<2x8xf32, #tpu.memory_space<vmem>>, %arg2: memref<1x32xf32, #tpu.memory_space<vmem>>, %arg3: memref<1x32xf32, #tpu.memory_space<vmem>>, %arg4: memref<32x96xbf16, #tpu.memory_space<vmem>>, %arg5: memref<1x96xf32, #tpu.memory_space<vmem>>, %arg6: memref<32x32xbf16, #tpu.memory_space<vmem>>, %arg7: memref<1x32xf32, #tpu.memory_space<vmem>>, %arg8: memref<1x32xf32, #tpu.memory_space<vmem>>, %arg9: memref<1x32xf32, #tpu.memory_space<vmem>>, %arg10: memref<32x64xbf16, #tpu.memory_space<vmem>>, %arg11: memref<1x64xf32, #tpu.memory_space<vmem>>, %arg12: memref<64x32xbf16, #tpu.memory_space<vmem>>, %arg13: memref<1x32xf32, #tpu.memory_space<vmem>>, %arg14: memref<1x32xf32, #tpu.memory_space<vmem>>, %arg15: memref<1x32xf32, #tpu.memory_space<vmem>>, %arg16: memref<32x96xbf16, #tpu.memory_space<vmem>>, %arg17: memref<1x96xf32, #tpu.memory_space<vmem>>, %arg18: memref<32x32xbf16, #tpu.memory_space<vmem>>, %arg19: memref<1x32xf32, #tpu.memory_space<vmem>>, %arg20: memref<1x32xf32, #tpu.memory_space<vmem>>, %arg21: memref<1x32xf32, #tpu.memory_space<vmem>>, %arg22: memref<32x64xbf16, #tpu.memory_space<vmem>>, %arg23: memref<1x64xf32, #tpu.memory_space<vmem>>, %arg24: memref<64x32xbf16, #tpu.memory_space<vmem>>, %arg25: memref<1x32xf32, #tpu.memory_space<vmem>>, %arg26: memref<1x32xf32, #tpu.memory_space<vmem>>, %arg27: memref<1x32xf32, #tpu.memory_space<vmem>>, %arg28: memref<32x32xbf16, #tpu.memory_space<vmem>>, %arg29: memref<1x32xf32, #tpu.memory_space<vmem>>, %arg30: memref<32x3xbf16, #tpu.memory_space<vmem>>, %arg31: memref<1x3xf32, #tpu.memory_space<vmem>>, %arg32: memref<2x3xf32, #tpu.memory_space<vmem>>, %arg33: memref<16x32xf32, #tpu.memory_space<vmem>>) attributes {dimension_semantics = [], scalar_prefetch = 0 : i64, scratch_operands = 1 : i64, tpu.core_type = #tpu.core_type<tc>} {
    %c0 = arith.constant 0 : index
    %c0_0 = arith.constant 0 : index
    %0 = vector.load %arg0[%c0, %c0_0] : memref<16x32xf32, #tpu.memory_space<vmem>>, vector<16x32xf32>
    %c0_1 = arith.constant 0 : index
    %c0_2 = arith.constant 0 : index
    %1 = vector.load %arg2[%c0_1, %c0_2] : memref<1x32xf32, #tpu.memory_space<vmem>>, vector<1x32xf32>
    %c0_3 = arith.constant 0 : index
    %c0_4 = arith.constant 0 : index
    %2 = vector.load %arg3[%c0_3, %c0_4] : memref<1x32xf32, #tpu.memory_space<vmem>>, vector<1x32xf32>
    %cst = arith.constant dense<0.000000e+00> : vector<16xf32>
    %3 = vector.multi_reduction <add>, %0, %cst [1] : vector<16x32xf32> to vector<16xf32>
    %4 = vector.shape_cast %3 : vector<16xf32> to vector<16x1xf32>
    %cst_5 = arith.constant 3.200000e+01 : f32
    %5 = vector.broadcast %cst_5 : f32 to vector<16x1xf32>
    %6 = arith.divf %4, %5 : vector<16x1xf32>
    %7 = vector.broadcast %6 : vector<16x1xf32> to vector<16x32xf32>
    %8 = arith.subf %0, %7 : vector<16x32xf32>
    %9 = arith.mulf %8, %8 : vector<16x32xf32>
    %cst_6 = arith.constant dense<0.000000e+00> : vector<16xf32>
    %10 = vector.multi_reduction <add>, %9, %cst_6 [1] : vector<16x32xf32> to vector<16xf32>
    %11 = vector.shape_cast %10 : vector<16xf32> to vector<16x1xf32>
    %cst_7 = arith.constant 3.200000e+01 : f32
    %12 = vector.broadcast %cst_7 : f32 to vector<16x1xf32>
    %13 = arith.divf %11, %12 : vector<16x1xf32>
    %cst_8 = arith.constant 9.99999996E-13 : f32
    %14 = vector.broadcast %cst_8 : f32 to vector<16x1xf32>
    %15 = arith.addf %13, %14 : vector<16x1xf32>
    %16 = math.rsqrt %15 : vector<16x1xf32>
    %17 = vector.broadcast %16 : vector<16x1xf32> to vector<16x32xf32>
    %18 = arith.mulf %8, %17 : vector<16x32xf32>
    %19 = vector.broadcast %1 : vector<1x32xf32> to vector<16x32xf32>
    %20 = arith.mulf %18, %19 : vector<16x32xf32>
    %21 = vector.broadcast %2 : vector<1x32xf32> to vector<16x32xf32>
    %22 = arith.addf %20, %21 : vector<16x32xf32>
    %c0_9 = arith.constant 0 : index
    %c0_10 = arith.constant 0 : index
    %23 = vector.load %arg1[%c0_9, %c0_10] : memref<2x8xf32, #tpu.memory_space<vmem>>, vector<2x8xf32>
    %24 = vector.shape_cast %23 : vector<2x8xf32> to vector<2x1x8xf32>
    %25 = arith.truncf %22 : vector<16x32xf32> to vector<16x32xbf16>
    %c0_11 = arith.constant 0 : index
    %c0_12 = arith.constant 0 : index
    %26 = vector.load %arg4[%c0_11, %c0_12] : memref<32x96xbf16, #tpu.memory_space<vmem>>, vector<32x96xbf16>
    %cst_13 = arith.constant dense<0.000000e+00> : vector<16x96xf32>
    %27 = tpu.matmul %25, %26, %cst_13 {dimension_numbers = #tpu.dot_dimension_numbers<[1], [0], [0], [1], [0, 0, 1, 1], [], []>} : vector<16x32xbf16>, vector<32x96xbf16>, vector<16x96xf32> -> vector<16x96xf32>
    %c0_14 = arith.constant 0 : index
    %c0_15 = arith.constant 0 : index
    %28 = vector.load %arg5[%c0_14, %c0_15] : memref<1x96xf32, #tpu.memory_space<vmem>>, vector<1x96xf32>
    %29 = vector.broadcast %28 : vector<1x96xf32> to vector<16x96xf32>
    %30 = arith.addf %27, %29 : vector<16x96xf32>
    %31 = vector.extract_strided_slice %30 {offsets = [0, 0], sizes = [16, 8], strides = [1, 1]} : vector<16x96xf32> to vector<16x8xf32>
    %32 = vector.shape_cast %31 : vector<16x8xf32> to vector<2x8x8xf32>
    %33 = vector.extract_strided_slice %30 {offsets = [0, 32], sizes = [16, 8], strides = [1, 1]} : vector<16x96xf32> to vector<16x8xf32>
    %34 = vector.shape_cast %33 : vector<16x8xf32> to vector<2x8x8xf32>
    %35 = vector.extract_strided_slice %30 {offsets = [0, 64], sizes = [16, 8], strides = [1, 1]} : vector<16x96xf32> to vector<16x8xf32>
    %36 = vector.shape_cast %35 : vector<16x8xf32> to vector<2x8x8xf32>
    "tpu.trace_start"() <{level = 10 : i32, message = "bqd,bkd->bqk"}> : () -> ()
    %cst_16 = arith.constant dense<0.000000e+00> : vector<2x8x8xf32>
    %37 = tpu.matmul %32, %34, %cst_16 {dimension_numbers = #tpu.dot_dimension_numbers<[2], [2], [1], [1], [0, 0, 0, 1, 1, 1], [0], [0]>} : vector<2x8x8xf32>, vector<2x8x8xf32>, vector<2x8x8xf32> -> vector<2x8x8xf32>
    "tpu.trace_stop"() : () -> ()
    %38 = vector.broadcast %24 : vector<2x1x8xf32> to vector<2x8x8xf32>
    %39 = arith.addf %37, %38 : vector<2x8x8xf32>
    %cst_17 = arith.constant dense<0xFF800000> : vector<2x8xf32>
    %40 = vector.multi_reduction <maximumf>, %39, %cst_17 [2] : vector<2x8x8xf32> to vector<2x8xf32>
    %41 = vector.shape_cast %40 : vector<2x8xf32> to vector<2x8x1xf32>
    %42 = vector.broadcast %41 : vector<2x8x1xf32> to vector<2x8x8xf32>
    %43 = arith.subf %39, %42 : vector<2x8x8xf32>
    %44 = math.exp %43 : vector<2x8x8xf32>
    %cst_18 = arith.constant dense<0.000000e+00> : vector<2x8xf32>
    %45 = vector.multi_reduction <add>, %44, %cst_18 [2] : vector<2x8x8xf32> to vector<2x8xf32>
    %46 = vector.shape_cast %45 : vector<2x8xf32> to vector<2x8x1xf32>
    %47 = tpu.reciprocal %46 {approx = true} : vector<2x8x1xf32> -> vector<2x8x1xf32>
    %48 = vector.broadcast %47 : vector<2x8x1xf32> to vector<2x8x8xf32>
    %49 = arith.mulf %44, %48 : vector<2x8x8xf32>
    "tpu.trace_start"() <{level = 10 : i32, message = "bqk,bkd->bqd"}> : () -> ()
    %cst_19 = arith.constant dense<0.000000e+00> : vector<2x8x8xf32>
    %50 = tpu.matmul %49, %36, %cst_19 {dimension_numbers = #tpu.dot_dimension_numbers<[2], [1], [1], [2], [0, 0, 0, 1, 1, 2], [0], [0]>} : vector<2x8x8xf32>, vector<2x8x8xf32>, vector<2x8x8xf32> -> vector<2x8x8xf32>
    "tpu.trace_stop"() : () -> ()
    %51 = vector.shape_cast %50 : vector<2x8x8xf32> to vector<16x8xf32>
    %c0_20 = arith.constant 0 : index
    %c0_21 = arith.constant 0 : index
    %52 = vector.load %arg33[%c0_20, %c0_21] : memref<16x32xf32, #tpu.memory_space<vmem>>, vector<16x8xf32>
    tpu.vector_store %arg33[%c0_20, %c0_21], %51 {strides = array<i32>} : memref<16x32xf32, #tpu.memory_space<vmem>>, vector<16x8xf32>,
    %53 = vector.extract_strided_slice %30 {offsets = [0, 8], sizes = [16, 8], strides = [1, 1]} : vector<16x96xf32> to vector<16x8xf32>
    %54 = vector.shape_cast %53 : vector<16x8xf32> to vector<2x8x8xf32>
    %55 = vector.extract_strided_slice %30 {offsets = [0, 40], sizes = [16, 8], strides = [1, 1]} : vector<16x96xf32> to vector<16x8xf32>
    %56 = vector.shape_cast %55 : vector<16x8xf32> to vector<2x8x8xf32>
    %57 = vector.extract_strided_slice %30 {offsets = [0, 72], sizes = [16, 8], strides = [1, 1]} : vector<16x96xf32> to vector<16x8xf32>
    %58 = vector.shape_cast %57 : vector<16x8xf32> to vector<2x8x8xf32>
    "tpu.trace_start"() <{level = 10 : i32, message = "bqd,bkd->bqk"}> : () -> ()
    %cst_22 = arith.constant dense<0.000000e+00> : vector<2x8x8xf32>
    %59 = tpu.matmul %54, %56, %cst_22 {dimension_numbers = #tpu.dot_dimension_numbers<[2], [2], [1], [1], [0, 0, 0, 1, 1, 1], [0], [0]>} : vector<2x8x8xf32>, vector<2x8x8xf32>, vector<2x8x8xf32> -> vector<2x8x8xf32>
    "tpu.trace_stop"() : () -> ()
    %60 = vector.broadcast %24 : vector<2x1x8xf32> to vector<2x8x8xf32>
    %61 = arith.addf %59, %60 : vector<2x8x8xf32>
    %cst_23 = arith.constant dense<0xFF800000> : vector<2x8xf32>
    %62 = vector.multi_reduction <maximumf>, %61, %cst_23 [2] : vector<2x8x8xf32> to vector<2x8xf32>
    %63 = vector.shape_cast %62 : vector<2x8xf32> to vector<2x8x1xf32>
    %64 = vector.broadcast %63 : vector<2x8x1xf32> to vector<2x8x8xf32>
    %65 = arith.subf %61, %64 : vector<2x8x8xf32>
    %66 = math.exp %65 : vector<2x8x8xf32>
    %cst_24 = arith.constant dense<0.000000e+00> : vector<2x8xf32>
    %67 = vector.multi_reduction <add>, %66, %cst_24 [2] : vector<2x8x8xf32> to vector<2x8xf32>
    %68 = vector.shape_cast %67 : vector<2x8xf32> to vector<2x8x1xf32>
    %69 = tpu.reciprocal %68 {approx = true} : vector<2x8x1xf32> -> vector<2x8x1xf32>
    %70 = vector.broadcast %69 : vector<2x8x1xf32> to vector<2x8x8xf32>
    %71 = arith.mulf %66, %70 : vector<2x8x8xf32>
    "tpu.trace_start"() <{level = 10 : i32, message = "bqk,bkd->bqd"}> : () -> ()
    %cst_25 = arith.constant dense<0.000000e+00> : vector<2x8x8xf32>
    %72 = tpu.matmul %71, %58, %cst_25 {dimension_numbers = #tpu.dot_dimension_numbers<[2], [1], [1], [2], [0, 0, 0, 1, 1, 2], [0], [0]>} : vector<2x8x8xf32>, vector<2x8x8xf32>, vector<2x8x8xf32> -> vector<2x8x8xf32>
    "tpu.trace_stop"() : () -> ()
    %73 = vector.shape_cast %72 : vector<2x8x8xf32> to vector<16x8xf32>
    %c0_26 = arith.constant 0 : index
    %c8 = arith.constant 8 : index
    %74 = vector.load %arg33[%c0_26, %c8] : memref<16x32xf32, #tpu.memory_space<vmem>>, vector<16x8xf32>
    tpu.vector_store %arg33[%c0_26, %c8], %73 {strides = array<i32>} : memref<16x32xf32, #tpu.memory_space<vmem>>, vector<16x8xf32>,
    %75 = vector.extract_strided_slice %30 {offsets = [0, 16], sizes = [16, 8], strides = [1, 1]} : vector<16x96xf32> to vector<16x8xf32>
    %76 = vector.shape_cast %75 : vector<16x8xf32> to vector<2x8x8xf32>
    %77 = vector.extract_strided_slice %30 {offsets = [0, 48], sizes = [16, 8], strides = [1, 1]} : vector<16x96xf32> to vector<16x8xf32>
    %78 = vector.shape_cast %77 : vector<16x8xf32> to vector<2x8x8xf32>
    %79 = vector.extract_strided_slice %30 {offsets = [0, 80], sizes = [16, 8], strides = [1, 1]} : vector<16x96xf32> to vector<16x8xf32>
    %80 = vector.shape_cast %79 : vector<16x8xf32> to vector<2x8x8xf32>
    "tpu.trace_start"() <{level = 10 : i32, message = "bqd,bkd->bqk"}> : () -> ()
    %cst_27 = arith.constant dense<0.000000e+00> : vector<2x8x8xf32>
    %81 = tpu.matmul %76, %78, %cst_27 {dimension_numbers = #tpu.dot_dimension_numbers<[2], [2], [1], [1], [0, 0, 0, 1, 1, 1], [0], [0]>} : vector<2x8x8xf32>, vector<2x8x8xf32>, vector<2x8x8xf32> -> vector<2x8x8xf32>
    "tpu.trace_stop"() : () -> ()
    %82 = vector.broadcast %24 : vector<2x1x8xf32> to vector<2x8x8xf32>
    %83 = arith.addf %81, %82 : vector<2x8x8xf32>
    %cst_28 = arith.constant dense<0xFF800000> : vector<2x8xf32>
    %84 = vector.multi_reduction <maximumf>, %83, %cst_28 [2] : vector<2x8x8xf32> to vector<2x8xf32>
    %85 = vector.shape_cast %84 : vector<2x8xf32> to vector<2x8x1xf32>
    %86 = vector.broadcast %85 : vector<2x8x1xf32> to vector<2x8x8xf32>
    %87 = arith.subf %83, %86 : vector<2x8x8xf32>
    %88 = math.exp %87 : vector<2x8x8xf32>
    %cst_29 = arith.constant dense<0.000000e+00> : vector<2x8xf32>
    %89 = vector.multi_reduction <add>, %88, %cst_29 [2] : vector<2x8x8xf32> to vector<2x8xf32>
    %90 = vector.shape_cast %89 : vector<2x8xf32> to vector<2x8x1xf32>
    %91 = tpu.reciprocal %90 {approx = true} : vector<2x8x1xf32> -> vector<2x8x1xf32>
    %92 = vector.broadcast %91 : vector<2x8x1xf32> to vector<2x8x8xf32>
    %93 = arith.mulf %88, %92 : vector<2x8x8xf32>
    "tpu.trace_start"() <{level = 10 : i32, message = "bqk,bkd->bqd"}> : () -> ()
    %cst_30 = arith.constant dense<0.000000e+00> : vector<2x8x8xf32>
    %94 = tpu.matmul %93, %80, %cst_30 {dimension_numbers = #tpu.dot_dimension_numbers<[2], [1], [1], [2], [0, 0, 0, 1, 1, 2], [0], [0]>} : vector<2x8x8xf32>, vector<2x8x8xf32>, vector<2x8x8xf32> -> vector<2x8x8xf32>
    "tpu.trace_stop"() : () -> ()
    %95 = vector.shape_cast %94 : vector<2x8x8xf32> to vector<16x8xf32>
    %c0_31 = arith.constant 0 : index
    %c16 = arith.constant 16 : index
    %96 = vector.load %arg33[%c0_31, %c16] : memref<16x32xf32, #tpu.memory_space<vmem>>, vector<16x8xf32>
    tpu.vector_store %arg33[%c0_31, %c16], %95 {strides = array<i32>} : memref<16x32xf32, #tpu.memory_space<vmem>>, vector<16x8xf32>,
    %97 = vector.extract_strided_slice %30 {offsets = [0, 24], sizes = [16, 8], strides = [1, 1]} : vector<16x96xf32> to vector<16x8xf32>
    %98 = vector.shape_cast %97 : vector<16x8xf32> to vector<2x8x8xf32>
    %99 = vector.extract_strided_slice %30 {offsets = [0, 56], sizes = [16, 8], strides = [1, 1]} : vector<16x96xf32> to vector<16x8xf32>
    %100 = vector.shape_cast %99 : vector<16x8xf32> to vector<2x8x8xf32>
    %101 = vector.extract_strided_slice %30 {offsets = [0, 88], sizes = [16, 8], strides = [1, 1]} : vector<16x96xf32> to vector<16x8xf32>
    %102 = vector.shape_cast %101 : vector<16x8xf32> to vector<2x8x8xf32>
    "tpu.trace_start"() <{level = 10 : i32, message = "bqd,bkd->bqk"}> : () -> ()
    %cst_32 = arith.constant dense<0.000000e+00> : vector<2x8x8xf32>
    %103 = tpu.matmul %98, %100, %cst_32 {dimension_numbers = #tpu.dot_dimension_numbers<[2], [2], [1], [1], [0, 0, 0, 1, 1, 1], [0], [0]>} : vector<2x8x8xf32>, vector<2x8x8xf32>, vector<2x8x8xf32> -> vector<2x8x8xf32>
    "tpu.trace_stop"() : () -> ()
    %104 = vector.broadcast %24 : vector<2x1x8xf32> to vector<2x8x8xf32>
    %105 = arith.addf %103, %104 : vector<2x8x8xf32>
    %cst_33 = arith.constant dense<0xFF800000> : vector<2x8xf32>
    %106 = vector.multi_reduction <maximumf>, %105, %cst_33 [2] : vector<2x8x8xf32> to vector<2x8xf32>
    %107 = vector.shape_cast %106 : vector<2x8xf32> to vector<2x8x1xf32>
    %108 = vector.broadcast %107 : vector<2x8x1xf32> to vector<2x8x8xf32>
    %109 = arith.subf %105, %108 : vector<2x8x8xf32>
    %110 = math.exp %109 : vector<2x8x8xf32>
    %cst_34 = arith.constant dense<0.000000e+00> : vector<2x8xf32>
    %111 = vector.multi_reduction <add>, %110, %cst_34 [2] : vector<2x8x8xf32> to vector<2x8xf32>
    %112 = vector.shape_cast %111 : vector<2x8xf32> to vector<2x8x1xf32>
    %113 = tpu.reciprocal %112 {approx = true} : vector<2x8x1xf32> -> vector<2x8x1xf32>
    %114 = vector.broadcast %113 : vector<2x8x1xf32> to vector<2x8x8xf32>
    %115 = arith.mulf %110, %114 : vector<2x8x8xf32>
    "tpu.trace_start"() <{level = 10 : i32, message = "bqk,bkd->bqd"}> : () -> ()
    %cst_35 = arith.constant dense<0.000000e+00> : vector<2x8x8xf32>
    %116 = tpu.matmul %115, %102, %cst_35 {dimension_numbers = #tpu.dot_dimension_numbers<[2], [1], [1], [2], [0, 0, 0, 1, 1, 2], [0], [0]>} : vector<2x8x8xf32>, vector<2x8x8xf32>, vector<2x8x8xf32> -> vector<2x8x8xf32>
    "tpu.trace_stop"() : () -> ()
    %117 = vector.shape_cast %116 : vector<2x8x8xf32> to vector<16x8xf32>
    %c0_36 = arith.constant 0 : index
    %c24 = arith.constant 24 : index
    %118 = vector.load %arg33[%c0_36, %c24] : memref<16x32xf32, #tpu.memory_space<vmem>>, vector<16x8xf32>
    tpu.vector_store %arg33[%c0_36, %c24], %117 {strides = array<i32>} : memref<16x32xf32, #tpu.memory_space<vmem>>, vector<16x8xf32>,
    %c0_37 = arith.constant 0 : index
    %c0_38 = arith.constant 0 : index
    %119 = vector.load %arg33[%c0_37, %c0_38] : memref<16x32xf32, #tpu.memory_space<vmem>>, vector<16x32xf32>
    %120 = arith.truncf %119 : vector<16x32xf32> to vector<16x32xbf16>
    %c0_39 = arith.constant 0 : index
    %c0_40 = arith.constant 0 : index
    %121 = vector.load %arg6[%c0_39, %c0_40] : memref<32x32xbf16, #tpu.memory_space<vmem>>, vector<32x32xbf16>
    %cst_41 = arith.constant dense<0.000000e+00> : vector<16x32xf32>
    %122 = tpu.matmul %120, %121, %cst_41 {dimension_numbers = #tpu.dot_dimension_numbers<[1], [0], [0], [1], [0, 0, 1, 1], [], []>} : vector<16x32xbf16>, vector<32x32xbf16>, vector<16x32xf32> -> vector<16x32xf32>
    %c0_42 = arith.constant 0 : index
    %c0_43 = arith.constant 0 : index
    %123 = vector.load %arg7[%c0_42, %c0_43] : memref<1x32xf32, #tpu.memory_space<vmem>>, vector<1x32xf32>
    %124 = vector.broadcast %123 : vector<1x32xf32> to vector<16x32xf32>
    %125 = arith.addf %122, %124 : vector<16x32xf32>
    %126 = arith.addf %125, %22 : vector<16x32xf32>
    %c0_44 = arith.constant 0 : index
    %c0_45 = arith.constant 0 : index
    %127 = vector.load %arg8[%c0_44, %c0_45] : memref<1x32xf32, #tpu.memory_space<vmem>>, vector<1x32xf32>
    %c0_46 = arith.constant 0 : index
    %c0_47 = arith.constant 0 : index
    %128 = vector.load %arg9[%c0_46, %c0_47] : memref<1x32xf32, #tpu.memory_space<vmem>>, vector<1x32xf32>
    %cst_48 = arith.constant dense<0.000000e+00> : vector<16xf32>
    %129 = vector.multi_reduction <add>, %126, %cst_48 [1] : vector<16x32xf32> to vector<16xf32>
    %130 = vector.shape_cast %129 : vector<16xf32> to vector<16x1xf32>
    %cst_49 = arith.constant 3.200000e+01 : f32
    %131 = vector.broadcast %cst_49 : f32 to vector<16x1xf32>
    %132 = arith.divf %130, %131 : vector<16x1xf32>
    %133 = vector.broadcast %132 : vector<16x1xf32> to vector<16x32xf32>
    %134 = arith.subf %126, %133 : vector<16x32xf32>
    %135 = arith.mulf %134, %134 : vector<16x32xf32>
    %cst_50 = arith.constant dense<0.000000e+00> : vector<16xf32>
    %136 = vector.multi_reduction <add>, %135, %cst_50 [1] : vector<16x32xf32> to vector<16xf32>
    %137 = vector.shape_cast %136 : vector<16xf32> to vector<16x1xf32>
    %cst_51 = arith.constant 3.200000e+01 : f32
    %138 = vector.broadcast %cst_51 : f32 to vector<16x1xf32>
    %139 = arith.divf %137, %138 : vector<16x1xf32>
    %cst_52 = arith.constant 9.99999996E-13 : f32
    %140 = vector.broadcast %cst_52 : f32 to vector<16x1xf32>
    %141 = arith.addf %139, %140 : vector<16x1xf32>
    %142 = math.rsqrt %141 : vector<16x1xf32>
    %143 = vector.broadcast %142 : vector<16x1xf32> to vector<16x32xf32>
    %144 = arith.mulf %134, %143 : vector<16x32xf32>
    %145 = vector.broadcast %127 : vector<1x32xf32> to vector<16x32xf32>
    %146 = arith.mulf %144, %145 : vector<16x32xf32>
    %147 = vector.broadcast %128 : vector<1x32xf32> to vector<16x32xf32>
    %148 = arith.addf %146, %147 : vector<16x32xf32>
    %149 = arith.truncf %148 : vector<16x32xf32> to vector<16x32xbf16>
    %c0_53 = arith.constant 0 : index
    %c0_54 = arith.constant 0 : index
    %150 = vector.load %arg10[%c0_53, %c0_54] : memref<32x64xbf16, #tpu.memory_space<vmem>>, vector<32x64xbf16>
    %cst_55 = arith.constant dense<0.000000e+00> : vector<16x64xf32>
    %151 = tpu.matmul %149, %150, %cst_55 {dimension_numbers = #tpu.dot_dimension_numbers<[1], [0], [0], [1], [0, 0, 1, 1], [], []>} : vector<16x32xbf16>, vector<32x64xbf16>, vector<16x64xf32> -> vector<16x64xf32>
    %c0_56 = arith.constant 0 : index
    %c0_57 = arith.constant 0 : index
    %152 = vector.load %arg11[%c0_56, %c0_57] : memref<1x64xf32, #tpu.memory_space<vmem>>, vector<1x64xf32>
    %153 = vector.broadcast %152 : vector<1x64xf32> to vector<16x64xf32>
    %154 = arith.addf %151, %153 : vector<16x64xf32>
    %cst_58 = arith.constant 5.000000e-01 : f32
    %155 = vector.broadcast %cst_58 : f32 to vector<16x64xf32>
    %156 = arith.mulf %155, %154 : vector<16x64xf32>
    %cst_59 = arith.constant 0.707106769 : f32
    %157 = vector.broadcast %cst_59 : f32 to vector<16x64xf32>
    %158 = arith.mulf %154, %157 : vector<16x64xf32>
    %159 = math.erf %158 : vector<16x64xf32>
    %cst_60 = arith.constant 1.000000e+00 : f32
    %160 = vector.broadcast %cst_60 : f32 to vector<16x64xf32>
    %161 = arith.addf %160, %159 : vector<16x64xf32>
    %162 = arith.mulf %156, %161 : vector<16x64xf32>
    %163 = arith.truncf %162 : vector<16x64xf32> to vector<16x64xbf16>
    %c0_61 = arith.constant 0 : index
    %c0_62 = arith.constant 0 : index
    %164 = vector.load %arg12[%c0_61, %c0_62] : memref<64x32xbf16, #tpu.memory_space<vmem>>, vector<64x32xbf16>
    %cst_63 = arith.constant dense<0.000000e+00> : vector<16x32xf32>
    %165 = tpu.matmul %163, %164, %cst_63 {dimension_numbers = #tpu.dot_dimension_numbers<[1], [0], [0], [1], [0, 0, 1, 1], [], []>} : vector<16x64xbf16>, vector<64x32xbf16>, vector<16x32xf32> -> vector<16x32xf32>
    %c0_64 = arith.constant 0 : index
    %c0_65 = arith.constant 0 : index
    %166 = vector.load %arg13[%c0_64, %c0_65] : memref<1x32xf32, #tpu.memory_space<vmem>>, vector<1x32xf32>
    %167 = vector.broadcast %166 : vector<1x32xf32> to vector<16x32xf32>
    %168 = arith.addf %165, %167 : vector<16x32xf32>
    %169 = arith.addf %168, %148 : vector<16x32xf32>
    %c0_66 = arith.constant 0 : index
    %c0_67 = arith.constant 0 : index
    %170 = vector.load %arg14[%c0_66, %c0_67] : memref<1x32xf32, #tpu.memory_space<vmem>>, vector<1x32xf32>
    %c0_68 = arith.constant 0 : index
    %c0_69 = arith.constant 0 : index
    %171 = vector.load %arg15[%c0_68, %c0_69] : memref<1x32xf32, #tpu.memory_space<vmem>>, vector<1x32xf32>
    %cst_70 = arith.constant dense<0.000000e+00> : vector<16xf32>
    %172 = vector.multi_reduction <add>, %169, %cst_70 [1] : vector<16x32xf32> to vector<16xf32>
    %173 = vector.shape_cast %172 : vector<16xf32> to vector<16x1xf32>
    %cst_71 = arith.constant 3.200000e+01 : f32
    %174 = vector.broadcast %cst_71 : f32 to vector<16x1xf32>
    %175 = arith.divf %173, %174 : vector<16x1xf32>
    %176 = vector.broadcast %175 : vector<16x1xf32> to vector<16x32xf32>
    %177 = arith.subf %169, %176 : vector<16x32xf32>
    %178 = arith.mulf %177, %177 : vector<16x32xf32>
    %cst_72 = arith.constant dense<0.000000e+00> : vector<16xf32>
    %179 = vector.multi_reduction <add>, %178, %cst_72 [1] : vector<16x32xf32> to vector<16xf32>
    %180 = vector.shape_cast %179 : vector<16xf32> to vector<16x1xf32>
    %cst_73 = arith.constant 3.200000e+01 : f32
    %181 = vector.broadcast %cst_73 : f32 to vector<16x1xf32>
    %182 = arith.divf %180, %181 : vector<16x1xf32>
    %cst_74 = arith.constant 9.99999996E-13 : f32
    %183 = vector.broadcast %cst_74 : f32 to vector<16x1xf32>
    %184 = arith.addf %182, %183 : vector<16x1xf32>
    %185 = math.rsqrt %184 : vector<16x1xf32>
    %186 = vector.broadcast %185 : vector<16x1xf32> to vector<16x32xf32>
    %187 = arith.mulf %177, %186 : vector<16x32xf32>
    %188 = vector.broadcast %170 : vector<1x32xf32> to vector<16x32xf32>
    %189 = arith.mulf %187, %188 : vector<16x32xf32>
    %190 = vector.broadcast %171 : vector<1x32xf32> to vector<16x32xf32>
    %191 = arith.addf %189, %190 : vector<16x32xf32>
    %192 = arith.truncf %191 : vector<16x32xf32> to vector<16x32xbf16>
    %c0_75 = arith.constant 0 : index
    %c0_76 = arith.constant 0 : index
    %193 = vector.load %arg16[%c0_75, %c0_76] : memref<32x96xbf16, #tpu.memory_space<vmem>>, vector<32x96xbf16>
    %cst_77 = arith.constant dense<0.000000e+00> : vector<16x96xf32>
    %194 = tpu.matmul %192, %193, %cst_77 {dimension_numbers = #tpu.dot_dimension_numbers<[1], [0], [0], [1], [0, 0, 1, 1], [], []>} : vector<16x32xbf16>, vector<32x96xbf16>, vector<16x96xf32> -> vector<16x96xf32>
    %c0_78 = arith.constant 0 : index
    %c0_79 = arith.constant 0 : index
    %195 = vector.load %arg17[%c0_78, %c0_79] : memref<1x96xf32, #tpu.memory_space<vmem>>, vector<1x96xf32>
    %196 = vector.broadcast %195 : vector<1x96xf32> to vector<16x96xf32>
    %197 = arith.addf %194, %196 : vector<16x96xf32>
    %198 = vector.extract_strided_slice %197 {offsets = [0, 0], sizes = [16, 8], strides = [1, 1]} : vector<16x96xf32> to vector<16x8xf32>
    %199 = vector.shape_cast %198 : vector<16x8xf32> to vector<2x8x8xf32>
    %200 = vector.extract_strided_slice %197 {offsets = [0, 32], sizes = [16, 8], strides = [1, 1]} : vector<16x96xf32> to vector<16x8xf32>
    %201 = vector.shape_cast %200 : vector<16x8xf32> to vector<2x8x8xf32>
    %202 = vector.extract_strided_slice %197 {offsets = [0, 64], sizes = [16, 8], strides = [1, 1]} : vector<16x96xf32> to vector<16x8xf32>
    %203 = vector.shape_cast %202 : vector<16x8xf32> to vector<2x8x8xf32>
    "tpu.trace_start"() <{level = 10 : i32, message = "bqd,bkd->bqk"}> : () -> ()
    %cst_80 = arith.constant dense<0.000000e+00> : vector<2x8x8xf32>
    %204 = tpu.matmul %199, %201, %cst_80 {dimension_numbers = #tpu.dot_dimension_numbers<[2], [2], [1], [1], [0, 0, 0, 1, 1, 1], [0], [0]>} : vector<2x8x8xf32>, vector<2x8x8xf32>, vector<2x8x8xf32> -> vector<2x8x8xf32>
    "tpu.trace_stop"() : () -> ()
    %205 = vector.broadcast %24 : vector<2x1x8xf32> to vector<2x8x8xf32>
    %206 = arith.addf %204, %205 : vector<2x8x8xf32>
    %cst_81 = arith.constant dense<0xFF800000> : vector<2x8xf32>
    %207 = vector.multi_reduction <maximumf>, %206, %cst_81 [2] : vector<2x8x8xf32> to vector<2x8xf32>
    %208 = vector.shape_cast %207 : vector<2x8xf32> to vector<2x8x1xf32>
    %209 = vector.broadcast %208 : vector<2x8x1xf32> to vector<2x8x8xf32>
    %210 = arith.subf %206, %209 : vector<2x8x8xf32>
    %211 = math.exp %210 : vector<2x8x8xf32>
    %cst_82 = arith.constant dense<0.000000e+00> : vector<2x8xf32>
    %212 = vector.multi_reduction <add>, %211, %cst_82 [2] : vector<2x8x8xf32> to vector<2x8xf32>
    %213 = vector.shape_cast %212 : vector<2x8xf32> to vector<2x8x1xf32>
    %214 = tpu.reciprocal %213 {approx = true} : vector<2x8x1xf32> -> vector<2x8x1xf32>
    %215 = vector.broadcast %214 : vector<2x8x1xf32> to vector<2x8x8xf32>
    %216 = arith.mulf %211, %215 : vector<2x8x8xf32>
    "tpu.trace_start"() <{level = 10 : i32, message = "bqk,bkd->bqd"}> : () -> ()
    %cst_83 = arith.constant dense<0.000000e+00> : vector<2x8x8xf32>
    %217 = tpu.matmul %216, %203, %cst_83 {dimension_numbers = #tpu.dot_dimension_numbers<[2], [1], [1], [2], [0, 0, 0, 1, 1, 2], [0], [0]>} : vector<2x8x8xf32>, vector<2x8x8xf32>, vector<2x8x8xf32> -> vector<2x8x8xf32>
    "tpu.trace_stop"() : () -> ()
    %218 = vector.shape_cast %217 : vector<2x8x8xf32> to vector<16x8xf32>
    %c0_84 = arith.constant 0 : index
    %c0_85 = arith.constant 0 : index
    %219 = vector.load %arg33[%c0_84, %c0_85] : memref<16x32xf32, #tpu.memory_space<vmem>>, vector<16x8xf32>
    tpu.vector_store %arg33[%c0_84, %c0_85], %218 {strides = array<i32>} : memref<16x32xf32, #tpu.memory_space<vmem>>, vector<16x8xf32>,
    %220 = vector.extract_strided_slice %197 {offsets = [0, 8], sizes = [16, 8], strides = [1, 1]} : vector<16x96xf32> to vector<16x8xf32>
    %221 = vector.shape_cast %220 : vector<16x8xf32> to vector<2x8x8xf32>
    %222 = vector.extract_strided_slice %197 {offsets = [0, 40], sizes = [16, 8], strides = [1, 1]} : vector<16x96xf32> to vector<16x8xf32>
    %223 = vector.shape_cast %222 : vector<16x8xf32> to vector<2x8x8xf32>
    %224 = vector.extract_strided_slice %197 {offsets = [0, 72], sizes = [16, 8], strides = [1, 1]} : vector<16x96xf32> to vector<16x8xf32>
    %225 = vector.shape_cast %224 : vector<16x8xf32> to vector<2x8x8xf32>
    "tpu.trace_start"() <{level = 10 : i32, message = "bqd,bkd->bqk"}> : () -> ()
    %cst_86 = arith.constant dense<0.000000e+00> : vector<2x8x8xf32>
    %226 = tpu.matmul %221, %223, %cst_86 {dimension_numbers = #tpu.dot_dimension_numbers<[2], [2], [1], [1], [0, 0, 0, 1, 1, 1], [0], [0]>} : vector<2x8x8xf32>, vector<2x8x8xf32>, vector<2x8x8xf32> -> vector<2x8x8xf32>
    "tpu.trace_stop"() : () -> ()
    %227 = vector.broadcast %24 : vector<2x1x8xf32> to vector<2x8x8xf32>
    %228 = arith.addf %226, %227 : vector<2x8x8xf32>
    %cst_87 = arith.constant dense<0xFF800000> : vector<2x8xf32>
    %229 = vector.multi_reduction <maximumf>, %228, %cst_87 [2] : vector<2x8x8xf32> to vector<2x8xf32>
    %230 = vector.shape_cast %229 : vector<2x8xf32> to vector<2x8x1xf32>
    %231 = vector.broadcast %230 : vector<2x8x1xf32> to vector<2x8x8xf32>
    %232 = arith.subf %228, %231 : vector<2x8x8xf32>
    %233 = math.exp %232 : vector<2x8x8xf32>
    %cst_88 = arith.constant dense<0.000000e+00> : vector<2x8xf32>
    %234 = vector.multi_reduction <add>, %233, %cst_88 [2] : vector<2x8x8xf32> to vector<2x8xf32>
    %235 = vector.shape_cast %234 : vector<2x8xf32> to vector<2x8x1xf32>
    %236 = tpu.reciprocal %235 {approx = true} : vector<2x8x1xf32> -> vector<2x8x1xf32>
    %237 = vector.broadcast %236 : vector<2x8x1xf32> to vector<2x8x8xf32>
    %238 = arith.mulf %233, %237 : vector<2x8x8xf32>
    "tpu.trace_start"() <{level = 10 : i32, message = "bqk,bkd->bqd"}> : () -> ()
    %cst_89 = arith.constant dense<0.000000e+00> : vector<2x8x8xf32>
    %239 = tpu.matmul %238, %225, %cst_89 {dimension_numbers = #tpu.dot_dimension_numbers<[2], [1], [1], [2], [0, 0, 0, 1, 1, 2], [0], [0]>} : vector<2x8x8xf32>, vector<2x8x8xf32>, vector<2x8x8xf32> -> vector<2x8x8xf32>
    "tpu.trace_stop"() : () -> ()
    %240 = vector.shape_cast %239 : vector<2x8x8xf32> to vector<16x8xf32>
    %c0_90 = arith.constant 0 : index
    %c8_91 = arith.constant 8 : index
    %241 = vector.load %arg33[%c0_90, %c8_91] : memref<16x32xf32, #tpu.memory_space<vmem>>, vector<16x8xf32>
    tpu.vector_store %arg33[%c0_90, %c8_91], %240 {strides = array<i32>} : memref<16x32xf32, #tpu.memory_space<vmem>>, vector<16x8xf32>,
    %242 = vector.extract_strided_slice %197 {offsets = [0, 16], sizes = [16, 8], strides = [1, 1]} : vector<16x96xf32> to vector<16x8xf32>
    %243 = vector.shape_cast %242 : vector<16x8xf32> to vector<2x8x8xf32>
    %244 = vector.extract_strided_slice %197 {offsets = [0, 48], sizes = [16, 8], strides = [1, 1]} : vector<16x96xf32> to vector<16x8xf32>
    %245 = vector.shape_cast %244 : vector<16x8xf32> to vector<2x8x8xf32>
    %246 = vector.extract_strided_slice %197 {offsets = [0, 80], sizes = [16, 8], strides = [1, 1]} : vector<16x96xf32> to vector<16x8xf32>
    %247 = vector.shape_cast %246 : vector<16x8xf32> to vector<2x8x8xf32>
    "tpu.trace_start"() <{level = 10 : i32, message = "bqd,bkd->bqk"}> : () -> ()
    %cst_92 = arith.constant dense<0.000000e+00> : vector<2x8x8xf32>
    %248 = tpu.matmul %243, %245, %cst_92 {dimension_numbers = #tpu.dot_dimension_numbers<[2], [2], [1], [1], [0, 0, 0, 1, 1, 1], [0], [0]>} : vector<2x8x8xf32>, vector<2x8x8xf32>, vector<2x8x8xf32> -> vector<2x8x8xf32>
    "tpu.trace_stop"() : () -> ()
    %249 = vector.broadcast %24 : vector<2x1x8xf32> to vector<2x8x8xf32>
    %250 = arith.addf %248, %249 : vector<2x8x8xf32>
    %cst_93 = arith.constant dense<0xFF800000> : vector<2x8xf32>
    %251 = vector.multi_reduction <maximumf>, %250, %cst_93 [2] : vector<2x8x8xf32> to vector<2x8xf32>
    %252 = vector.shape_cast %251 : vector<2x8xf32> to vector<2x8x1xf32>
    %253 = vector.broadcast %252 : vector<2x8x1xf32> to vector<2x8x8xf32>
    %254 = arith.subf %250, %253 : vector<2x8x8xf32>
    %255 = math.exp %254 : vector<2x8x8xf32>
    %cst_94 = arith.constant dense<0.000000e+00> : vector<2x8xf32>
    %256 = vector.multi_reduction <add>, %255, %cst_94 [2] : vector<2x8x8xf32> to vector<2x8xf32>
    %257 = vector.shape_cast %256 : vector<2x8xf32> to vector<2x8x1xf32>
    %258 = tpu.reciprocal %257 {approx = true} : vector<2x8x1xf32> -> vector<2x8x1xf32>
    %259 = vector.broadcast %258 : vector<2x8x1xf32> to vector<2x8x8xf32>
    %260 = arith.mulf %255, %259 : vector<2x8x8xf32>
    "tpu.trace_start"() <{level = 10 : i32, message = "bqk,bkd->bqd"}> : () -> ()
    %cst_95 = arith.constant dense<0.000000e+00> : vector<2x8x8xf32>
    %261 = tpu.matmul %260, %247, %cst_95 {dimension_numbers = #tpu.dot_dimension_numbers<[2], [1], [1], [2], [0, 0, 0, 1, 1, 2], [0], [0]>} : vector<2x8x8xf32>, vector<2x8x8xf32>, vector<2x8x8xf32> -> vector<2x8x8xf32>
    "tpu.trace_stop"() : () -> ()
    %262 = vector.shape_cast %261 : vector<2x8x8xf32> to vector<16x8xf32>
    %c0_96 = arith.constant 0 : index
    %c16_97 = arith.constant 16 : index
    %263 = vector.load %arg33[%c0_96, %c16_97] : memref<16x32xf32, #tpu.memory_space<vmem>>, vector<16x8xf32>
    tpu.vector_store %arg33[%c0_96, %c16_97], %262 {strides = array<i32>} : memref<16x32xf32, #tpu.memory_space<vmem>>, vector<16x8xf32>,
    %264 = vector.extract_strided_slice %197 {offsets = [0, 24], sizes = [16, 8], strides = [1, 1]} : vector<16x96xf32> to vector<16x8xf32>
    %265 = vector.shape_cast %264 : vector<16x8xf32> to vector<2x8x8xf32>
    %266 = vector.extract_strided_slice %197 {offsets = [0, 56], sizes = [16, 8], strides = [1, 1]} : vector<16x96xf32> to vector<16x8xf32>
    %267 = vector.shape_cast %266 : vector<16x8xf32> to vector<2x8x8xf32>
    %268 = vector.extract_strided_slice %197 {offsets = [0, 88], sizes = [16, 8], strides = [1, 1]} : vector<16x96xf32> to vector<16x8xf32>
    %269 = vector.shape_cast %268 : vector<16x8xf32> to vector<2x8x8xf32>
    "tpu.trace_start"() <{level = 10 : i32, message = "bqd,bkd->bqk"}> : () -> ()
    %cst_98 = arith.constant dense<0.000000e+00> : vector<2x8x8xf32>
    %270 = tpu.matmul %265, %267, %cst_98 {dimension_numbers = #tpu.dot_dimension_numbers<[2], [2], [1], [1], [0, 0, 0, 1, 1, 1], [0], [0]>} : vector<2x8x8xf32>, vector<2x8x8xf32>, vector<2x8x8xf32> -> vector<2x8x8xf32>
    "tpu.trace_stop"() : () -> ()
    %271 = vector.broadcast %24 : vector<2x1x8xf32> to vector<2x8x8xf32>
    %272 = arith.addf %270, %271 : vector<2x8x8xf32>
    %cst_99 = arith.constant dense<0xFF800000> : vector<2x8xf32>
    %273 = vector.multi_reduction <maximumf>, %272, %cst_99 [2] : vector<2x8x8xf32> to vector<2x8xf32>
    %274 = vector.shape_cast %273 : vector<2x8xf32> to vector<2x8x1xf32>
    %275 = vector.broadcast %274 : vector<2x8x1xf32> to vector<2x8x8xf32>
    %276 = arith.subf %272, %275 : vector<2x8x8xf32>
    %277 = math.exp %276 : vector<2x8x8xf32>
    %cst_100 = arith.constant dense<0.000000e+00> : vector<2x8xf32>
    %278 = vector.multi_reduction <add>, %277, %cst_100 [2] : vector<2x8x8xf32> to vector<2x8xf32>
    %279 = vector.shape_cast %278 : vector<2x8xf32> to vector<2x8x1xf32>
    %280 = tpu.reciprocal %279 {approx = true} : vector<2x8x1xf32> -> vector<2x8x1xf32>
    %281 = vector.broadcast %280 : vector<2x8x1xf32> to vector<2x8x8xf32>
    %282 = arith.mulf %277, %281 : vector<2x8x8xf32>
    "tpu.trace_start"() <{level = 10 : i32, message = "bqk,bkd->bqd"}> : () -> ()
    %cst_101 = arith.constant dense<0.000000e+00> : vector<2x8x8xf32>
    %283 = tpu.matmul %282, %269, %cst_101 {dimension_numbers = #tpu.dot_dimension_numbers<[2], [1], [1], [2], [0, 0, 0, 1, 1, 2], [0], [0]>} : vector<2x8x8xf32>, vector<2x8x8xf32>, vector<2x8x8xf32> -> vector<2x8x8xf32>
    "tpu.trace_stop"() : () -> ()
    %284 = vector.shape_cast %283 : vector<2x8x8xf32> to vector<16x8xf32>
    %c0_102 = arith.constant 0 : index
    %c24_103 = arith.constant 24 : index
    %285 = vector.load %arg33[%c0_102, %c24_103] : memref<16x32xf32, #tpu.memory_space<vmem>>, vector<16x8xf32>
    tpu.vector_store %arg33[%c0_102, %c24_103], %284 {strides = array<i32>} : memref<16x32xf32, #tpu.memory_space<vmem>>, vector<16x8xf32>,
    %c0_104 = arith.constant 0 : index
    %c0_105 = arith.constant 0 : index
    %286 = vector.load %arg33[%c0_104, %c0_105] : memref<16x32xf32, #tpu.memory_space<vmem>>, vector<16x32xf32>
    %287 = arith.truncf %286 : vector<16x32xf32> to vector<16x32xbf16>
    %c0_106 = arith.constant 0 : index
    %c0_107 = arith.constant 0 : index
    %288 = vector.load %arg18[%c0_106, %c0_107] : memref<32x32xbf16, #tpu.memory_space<vmem>>, vector<32x32xbf16>
    %cst_108 = arith.constant dense<0.000000e+00> : vector<16x32xf32>
    %289 = tpu.matmul %287, %288, %cst_108 {dimension_numbers = #tpu.dot_dimension_numbers<[1], [0], [0], [1], [0, 0, 1, 1], [], []>} : vector<16x32xbf16>, vector<32x32xbf16>, vector<16x32xf32> -> vector<16x32xf32>
    %c0_109 = arith.constant 0 : index
    %c0_110 = arith.constant 0 : index
    %290 = vector.load %arg19[%c0_109, %c0_110] : memref<1x32xf32, #tpu.memory_space<vmem>>, vector<1x32xf32>
    %291 = vector.broadcast %290 : vector<1x32xf32> to vector<16x32xf32>
    %292 = arith.addf %289, %291 : vector<16x32xf32>
    %293 = arith.addf %292, %191 : vector<16x32xf32>
    %c0_111 = arith.constant 0 : index
    %c0_112 = arith.constant 0 : index
    %294 = vector.load %arg20[%c0_111, %c0_112] : memref<1x32xf32, #tpu.memory_space<vmem>>, vector<1x32xf32>
    %c0_113 = arith.constant 0 : index
    %c0_114 = arith.constant 0 : index
    %295 = vector.load %arg21[%c0_113, %c0_114] : memref<1x32xf32, #tpu.memory_space<vmem>>, vector<1x32xf32>
    %cst_115 = arith.constant dense<0.000000e+00> : vector<16xf32>
    %296 = vector.multi_reduction <add>, %293, %cst_115 [1] : vector<16x32xf32> to vector<16xf32>
    %297 = vector.shape_cast %296 : vector<16xf32> to vector<16x1xf32>
    %cst_116 = arith.constant 3.200000e+01 : f32
    %298 = vector.broadcast %cst_116 : f32 to vector<16x1xf32>
    %299 = arith.divf %297, %298 : vector<16x1xf32>
    %300 = vector.broadcast %299 : vector<16x1xf32> to vector<16x32xf32>
    %301 = arith.subf %293, %300 : vector<16x32xf32>
    %302 = arith.mulf %301, %301 : vector<16x32xf32>
    %cst_117 = arith.constant dense<0.000000e+00> : vector<16xf32>
    %303 = vector.multi_reduction <add>, %302, %cst_117 [1] : vector<16x32xf32> to vector<16xf32>
    %304 = vector.shape_cast %303 : vector<16xf32> to vector<16x1xf32>
    %cst_118 = arith.constant 3.200000e+01 : f32
    %305 = vector.broadcast %cst_118 : f32 to vector<16x1xf32>
    %306 = arith.divf %304, %305 : vector<16x1xf32>
    %cst_119 = arith.constant 9.99999996E-13 : f32
    %307 = vector.broadcast %cst_119 : f32 to vector<16x1xf32>
    %308 = arith.addf %306, %307 : vector<16x1xf32>
    %309 = math.rsqrt %308 : vector<16x1xf32>
    %310 = vector.broadcast %309 : vector<16x1xf32> to vector<16x32xf32>
    %311 = arith.mulf %301, %310 : vector<16x32xf32>
    %312 = vector.broadcast %294 : vector<1x32xf32> to vector<16x32xf32>
    %313 = arith.mulf %311, %312 : vector<16x32xf32>
    %314 = vector.broadcast %295 : vector<1x32xf32> to vector<16x32xf32>
    %315 = arith.addf %313, %314 : vector<16x32xf32>
    %316 = arith.truncf %315 : vector<16x32xf32> to vector<16x32xbf16>
    %c0_120 = arith.constant 0 : index
    %c0_121 = arith.constant 0 : index
    %317 = vector.load %arg22[%c0_120, %c0_121] : memref<32x64xbf16, #tpu.memory_space<vmem>>, vector<32x64xbf16>
    %cst_122 = arith.constant dense<0.000000e+00> : vector<16x64xf32>
    %318 = tpu.matmul %316, %317, %cst_122 {dimension_numbers = #tpu.dot_dimension_numbers<[1], [0], [0], [1], [0, 0, 1, 1], [], []>} : vector<16x32xbf16>, vector<32x64xbf16>, vector<16x64xf32> -> vector<16x64xf32>
    %c0_123 = arith.constant 0 : index
    %c0_124 = arith.constant 0 : index
    %319 = vector.load %arg23[%c0_123, %c0_124] : memref<1x64xf32, #tpu.memory_space<vmem>>, vector<1x64xf32>
    %320 = vector.broadcast %319 : vector<1x64xf32> to vector<16x64xf32>
    %321 = arith.addf %318, %320 : vector<16x64xf32>
    %cst_125 = arith.constant 5.000000e-01 : f32
    %322 = vector.broadcast %cst_125 : f32 to vector<16x64xf32>
    %323 = arith.mulf %322, %321 : vector<16x64xf32>
    %cst_126 = arith.constant 0.707106769 : f32
    %324 = vector.broadcast %cst_126 : f32 to vector<16x64xf32>
    %325 = arith.mulf %321, %324 : vector<16x64xf32>
    %326 = math.erf %325 : vector<16x64xf32>
    %cst_127 = arith.constant 1.000000e+00 : f32
    %327 = vector.broadcast %cst_127 : f32 to vector<16x64xf32>
    %328 = arith.addf %327, %326 : vector<16x64xf32>
    %329 = arith.mulf %323, %328 : vector<16x64xf32>
    %330 = arith.truncf %329 : vector<16x64xf32> to vector<16x64xbf16>
    %c0_128 = arith.constant 0 : index
    %c0_129 = arith.constant 0 : index
    %331 = vector.load %arg24[%c0_128, %c0_129] : memref<64x32xbf16, #tpu.memory_space<vmem>>, vector<64x32xbf16>
    %cst_130 = arith.constant dense<0.000000e+00> : vector<16x32xf32>
    %332 = tpu.matmul %330, %331, %cst_130 {dimension_numbers = #tpu.dot_dimension_numbers<[1], [0], [0], [1], [0, 0, 1, 1], [], []>} : vector<16x64xbf16>, vector<64x32xbf16>, vector<16x32xf32> -> vector<16x32xf32>
    %c0_131 = arith.constant 0 : index
    %c0_132 = arith.constant 0 : index
    %333 = vector.load %arg25[%c0_131, %c0_132] : memref<1x32xf32, #tpu.memory_space<vmem>>, vector<1x32xf32>
    %334 = vector.broadcast %333 : vector<1x32xf32> to vector<16x32xf32>
    %335 = arith.addf %332, %334 : vector<16x32xf32>
    %336 = arith.addf %335, %315 : vector<16x32xf32>
    %c0_133 = arith.constant 0 : index
    %c0_134 = arith.constant 0 : index
    %337 = vector.load %arg26[%c0_133, %c0_134] : memref<1x32xf32, #tpu.memory_space<vmem>>, vector<1x32xf32>
    %c0_135 = arith.constant 0 : index
    %c0_136 = arith.constant 0 : index
    %338 = vector.load %arg27[%c0_135, %c0_136] : memref<1x32xf32, #tpu.memory_space<vmem>>, vector<1x32xf32>
    %cst_137 = arith.constant dense<0.000000e+00> : vector<16xf32>
    %339 = vector.multi_reduction <add>, %336, %cst_137 [1] : vector<16x32xf32> to vector<16xf32>
    %340 = vector.shape_cast %339 : vector<16xf32> to vector<16x1xf32>
    %cst_138 = arith.constant 3.200000e+01 : f32
    %341 = vector.broadcast %cst_138 : f32 to vector<16x1xf32>
    %342 = arith.divf %340, %341 : vector<16x1xf32>
    %343 = vector.broadcast %342 : vector<16x1xf32> to vector<16x32xf32>
    %344 = arith.subf %336, %343 : vector<16x32xf32>
    %345 = arith.mulf %344, %344 : vector<16x32xf32>
    %cst_139 = arith.constant dense<0.000000e+00> : vector<16xf32>
    %346 = vector.multi_reduction <add>, %345, %cst_139 [1] : vector<16x32xf32> to vector<16xf32>
    %347 = vector.shape_cast %346 : vector<16xf32> to vector<16x1xf32>
    %cst_140 = arith.constant 3.200000e+01 : f32
    %348 = vector.broadcast %cst_140 : f32 to vector<16x1xf32>
    %349 = arith.divf %347, %348 : vector<16x1xf32>
    %cst_141 = arith.constant 9.99999996E-13 : f32
    %350 = vector.broadcast %cst_141 : f32 to vector<16x1xf32>
    %351 = arith.addf %349, %350 : vector<16x1xf32>
    %352 = math.rsqrt %351 : vector<16x1xf32>
    %353 = vector.broadcast %352 : vector<16x1xf32> to vector<16x32xf32>
    %354 = arith.mulf %344, %353 : vector<16x32xf32>
    %355 = vector.broadcast %337 : vector<1x32xf32> to vector<16x32xf32>
    %356 = arith.mulf %354, %355 : vector<16x32xf32>
    %357 = vector.broadcast %338 : vector<1x32xf32> to vector<16x32xf32>
    %358 = arith.addf %356, %357 : vector<16x32xf32>
    %359 = vector.shape_cast %358 : vector<16x32xf32> to vector<2x8x32xf32>
    %360 = vector.extract_strided_slice %359 {offsets = [0, 0, 0], sizes = [2, 1, 32], strides = [1, 1, 1]} : vector<2x8x32xf32> to vector<2x1x32xf32>
    %361 = vector.shape_cast %360 : vector<2x1x32xf32> to vector<2x32xf32>
    %362 = arith.truncf %361 : vector<2x32xf32> to vector<2x32xbf16>
    %c0_142 = arith.constant 0 : index
    %c0_143 = arith.constant 0 : index
    %363 = vector.load %arg28[%c0_142, %c0_143] : memref<32x32xbf16, #tpu.memory_space<vmem>>, vector<32x32xbf16>
    %cst_144 = arith.constant dense<0.000000e+00> : vector<2x32xf32>
    %364 = tpu.matmul %362, %363, %cst_144 {dimension_numbers = #tpu.dot_dimension_numbers<[1], [0], [0], [1], [0, 0, 1, 1], [], []>} : vector<2x32xbf16>, vector<32x32xbf16>, vector<2x32xf32> -> vector<2x32xf32>
    %c0_145 = arith.constant 0 : index
    %c0_146 = arith.constant 0 : index
    %365 = vector.load %arg29[%c0_145, %c0_146] : memref<1x32xf32, #tpu.memory_space<vmem>>, vector<1x32xf32>
    %366 = vector.broadcast %365 : vector<1x32xf32> to vector<2x32xf32>
    %367 = arith.addf %364, %366 : vector<2x32xf32>
    %368 = math.tanh %367 : vector<2x32xf32>
    %369 = arith.truncf %368 : vector<2x32xf32> to vector<2x32xbf16>
    %c0_147 = arith.constant 0 : index
    %c0_148 = arith.constant 0 : index
    %370 = vector.load %arg30[%c0_147, %c0_148] : memref<32x3xbf16, #tpu.memory_space<vmem>>, vector<32x3xbf16>
    %cst_149 = arith.constant dense<0.000000e+00> : vector<2x3xf32>
    %371 = tpu.matmul %369, %370, %cst_149 {dimension_numbers = #tpu.dot_dimension_numbers<[1], [0], [0], [1], [0, 0, 1, 1], [], []>} : vector<2x32xbf16>, vector<32x3xbf16>, vector<2x3xf32> -> vector<2x3xf32>
    %c0_150 = arith.constant 0 : index
    %c0_151 = arith.constant 0 : index
    %372 = vector.load %arg31[%c0_150, %c0_151] : memref<1x3xf32, #tpu.memory_space<vmem>>, vector<1x3xf32>
    %373 = vector.broadcast %372 : vector<1x3xf32> to vector<2x3xf32>
    %374 = arith.addf %371, %373 : vector<2x3xf32>
    %c0_152 = arith.constant 0 : index
    %c0_153 = arith.constant 0 : index
    %375 = vector.load %arg32[%c0_152, %c0_153] : memref<2x3xf32, #tpu.memory_space<vmem>>, vector<2x3xf32>
    tpu.vector_store %arg32[%c0_152, %c0_153], %374 {strides = array<i32>} : memref<2x3xf32, #tpu.memory_space<vmem>>, vector<2x3xf32>,
    return
  }
}

</mosaic_0001>

<bundles_post_ra>
// kernel: tpu_custom_call.1
= control target key start
LH: loop header
LB: loop body
LE: loop exit
PB: predicated region body
PF: predicated region fallthrough
CT: control target
= control target key end

     0   :  { %s4950_s6 = smov 1   ;;  %s4951_s10 = smov 2   ;;  %s5656_s0 = inlined_call_operand.smem [shape: u32[33], index: -1, kind: input, shape index: {}] }
   0x1   :  { %s5020_s5 = sld [smem:[%s5656_s0]]   ;;  %s4952_s14 = smov 3  }
   0x2   :  { %s5025_s9 = sld [smem:[%s5656_s0 + %s4950_s6]]   ;;  %s4953_s18 = smov 4  }
   0x3   :  { %s5030_s13 = sld [smem:[%s5656_s0 + %s4951_s10]]   ;;  %s4954_s22 = smov 5  }
   0x4   :  { %s5035_s17 = sld [smem:[%s5656_s0 + %s4952_s14]]   ;;  %s4955_s26 = smov 6  }
   0x5   :  { %s5040_s21 = sld [smem:[%s5656_s0 + %s4953_s18]]   ;;  %s4956_s30 = smov 7  }
   0x6   :  { %s5045_s25 = sld [smem:[%s5656_s0 + %s4954_s22]]   ;;  %s4957_s4 = smov 8  }
   0x7   :  { %s5050_s29 = sld [smem:[%s5656_s0 + %s4955_s26]]   ;;  %s4958_s10 = smov 9  }
   0x8   :  { %s5055_s3 = sld [smem:[%s5656_s0 + %s4956_s30]]   ;;  %s4959_s15 = smov 10  }
   0x9   :  { %s5060_s8 = sld [smem:[%s5656_s0 + %s4957_s4]]   ;;  %s4960_s20 = smov 11  }
   0xa   :  { %s5065_s14 = sld [smem:[%s5656_s0 + %s4958_s10]]   ;;  %s4961_s26 = smov 12  }
   0xb   :  { %s5070_s19 = sld [smem:[%s5656_s0 + %s4959_s15]]   ;;  %s4962_s1 = smov 13  }
   0xc   :  { %s5075_s24 = sld [smem:[%s5656_s0 + %s4960_s20]]   ;;  %s4963_s7 = smov 14  }
   0xd   :  { %5665 = sst [smem:[#allocation32_spill]] %s5050_s29  ;;  %s4964_s15 = smov 15  }
   0xe   :  { %s5080_s30 = sld [smem:[%s5656_s0 + %s4961_s26]]   ;;  %s4965_s22 = smov 16  }
   0xf   :  { %s5085_s6 = sld [smem:[%s5656_s0 + %s4962_s1]]   ;;  %s4966_s28 = smov 17  }
  0x10   :  { %s5090_s12 = sld [smem:[%s5656_s0 + %s4963_s7]]   ;;  %s4967_s7 = smov 18  }
  0x11   :  { %5666 = sst [smem:[#allocation33_spill]] %s5070_s19 }
  0x12   :  { %s5095_s20 = sld [smem:[%s5656_s0 + %s4964_s15]]   ;;  %s4968_s15 = smov 19  }
  0x13   :  { %s5100_s27 = sld [smem:[%s5656_s0 + %s4965_s22]]   ;;  %s4969_s22 = smov 20  }
  0x14   :  { %5667 = sst [smem:[#allocation34_spill]] %s5080_s30 }
  0x15   :  { %s5105_s4 = sld [smem:[%s5656_s0 + %s4966_s28]]   ;;  %s4970_s28 = smov 21  }
  0x16   :  { %s5110_s30 = sld [smem:[%s5656_s0 + %s4967_s7]]   ;;  %s4971_s7 = smov 22  }
  0x17   :  { %s5115_s19 = sld [smem:[%s5656_s0 + %s4968_s15]]   ;;  %s4972_s15 = smov 23  }
  0x18   :  { %s5125_s29 = sld [smem:[%s5656_s0 + %s4970_s28]]   ;;  %s4974_s28 = smov 25  }
  0x19   :  { %5668 = sst [smem:[#allocation35_spill]] %s5100_s27 }
  0x1a   :  { %s5120_s27 = sld [smem:[%s5656_s0 + %s4969_s22]]   ;;  %s4973_s22 = smov 24  }
  0x1c   :  { %5669 = sst [smem:[#allocation36_spill]] %s5110_s30 }
  0x1d   :  { %5670 = sst [smem:[#allocation37_spill]] %s5115_s19 }
  0x1e   :  { %5672 = sst [smem:[#allocation39_spill]] %s5125_s29 }
  0x1f   :  { %s5130_s30 = sld [smem:[%s5656_s0 + %s4971_s7]]   ;;  %s4975_s7 = smov 26  }
  0x20   :  { %5671 = sst [smem:[#allocation38_spill]] %s5120_s27 }
  0x21   :  { %s5135_s19 = sld [smem:[%s5656_s0 + %s4972_s15]]   ;;  %s4976_s15 = smov 27  }
  0x22   :  { %s5140_s27 = sld [smem:[%s5656_s0 + %s4973_s22]]   ;;  %s4977_s22 = smov 28  }
  0x23   :  { %s5145_s29 = sld [smem:[%s5656_s0 + %s4974_s28]]   ;;  %s4978_s28 = smov 29  }
  0x25   :  { %5673 = sst [smem:[#allocation40_spill]] %s5130_s30 }
  0x26   :  { %s5150_s30 = sld [smem:[%s5656_s0 + %s4975_s7]]   ;;  %s4979_s7 = smov 30  }
  0x27   :  { %5674 = sst [smem:[#allocation41_spill]] %s5135_s19 }
  0x28   :  { %5675 = sst [smem:[#allocation42_spill]] %s5140_s27 }
  0x29   :  { %5676 = sst [smem:[#allocation43_spill]] %s5145_s29 }
  0x2a   :  { %s5155_s19 = sld [smem:[%s5656_s0 + %s4976_s15]]   ;;  %s4980_s15 = smov 31  }
  0x2b   :  { %s5160_s27 = sld [smem:[%s5656_s0 + %s4977_s22]]   ;;  %s4981_s22 = smov 32  }
  0x2c   :  { %5677 = sst [smem:[#allocation44_spill]] %s5150_s30 }
  0x2d   :  { %s5165_s29 = sld [smem:[%s5656_s0 + %s4978_s28]]  }
  0x2e   :  { %s5170_s30 = sld [smem:[%s5656_s0 + %s4979_s7]]  }
  0x30   :  { %5678 = sst [smem:[#allocation45_spill]] %s5155_s19 }
  0x31   :  { %5679 = sst [smem:[#allocation46_spill]] %s5160_s27 }
  0x32   :  { %s5175_s19 = sld [smem:[%s5656_s0 + %s4980_s15]]  }
  0x33   :  { %s5180_s27 = sld [smem:[%s5656_s0 + %s4981_s22]]  }
  0x34   :  { %70 = vsyncpa [#allocation4], 0 }
  0x35   :  { %71 = vsyncpa [#allocation7], 0 }
  0x36   :  { %72 = vsyncpa [#allocation10], 0 }
  0x37   :  { %73 = vsyncpa [#allocation13], 0 }
  0x38   :  { %74 = vsyncpa [#allocation16], 0 }
  0x39   :  { %75 = vsyncpa [#allocation19], 0 }
  0x3a   :  { %76 = vsyncpa [#allocation22], 0 }
  0x3b   :  { %77 = vsyncpa [#allocation5], 0  ;;  %s4982_s28 = smov [#allocation6]   ;;  %s4983_s2 = smov [#allocation9]  }
  0x3c   :  { %s96_s1 = sshll.u32 %s4982_s28, 4  ;;  %s118_s7 = sshll.u32 %s4983_s2, 4  ;;  %s97_s1 = int_to_ptr.vmem [resolvable:$true] %s96_s1  ;;  %s119_s7 = int_to_ptr.vmem [resolvable:$true] %s118_s7 }
  0x3d   :  { %s4682_s10 = scalar_lea.vmem %s97_s1, 16  ;;  %s4686_s11 = scalar_lea.vmem %s97_s1, 32 }
  0x3e   :  { %p4683_p0 = scmp.ne.s32.totalorder %s97_s1, %s4682_s10  ;;  %p4687_p1 = scmp.lt.s32.totalorder %s97_s1, %s97_s1 }
  0x3f   :  { %p4688_p2 = scmp.lt.s32.totalorder %s4686_s11, %s4682_s10 }
  0x41   :  { %p4689_p3 = por %p4688_p2, %p4687_p1 }
  0x43   :  { %p4690_p4 = pnand %p4689_p3, %p4683_p0 }
  0x45   :  { %4693 = shalt.err (!%p4690_p4)
}
  0x46   :  { %99 = dma.hbm_to_vmem [thread:$0]  %s5030_s13, 16, %s97_s1, [#allocation7]  }
  0x47   :  { %s4702_s0 = scalar_lea.vmem %s119_s7, 16  ;;  %s4706_s15 = scalar_lea.vmem %s119_s7, 32 }
  0x48   :  { %p4703_p5 = scmp.ne.s32.totalorder %s119_s7, %s4702_s0  ;;  %p4707_p6 = scmp.lt.s32.totalorder %s119_s7, %s119_s7 }
  0x49   :  { %p4708_p7 = scmp.lt.s32.totalorder %s4706_s15, %s4702_s0 }
  0x4b   :  { %p4709_p8 = por %p4708_p7, %p4707_p6 }
  0x4d   :  { %p4710_p9 = pnand %p4709_p8, %p4703_p5 }
  0x4f   :  { %4713 = shalt.err (!%p4710_p9)
}
  0x50   :  { %121 = dma.hbm_to_vmem [thread:$0]  %s5045_s25, 16, %s119_s7, [#allocation10]  }
  0x51   :  { %s4984_s16 = smov [#allocation12]   ;;  %s4985_s22 = smov [#allocation15]  }
  0x52   :  { %s140_s18 = sshll.u32 %s4984_s16, 4  ;;  %s162_s23 = sshll.u32 %s4985_s22, 4  ;;  %s141_s18 = int_to_ptr.vmem [resolvable:$true] %s140_s18  ;;  %s163_s23 = int_to_ptr.vmem [resolvable:$true] %s162_s23 }
  0x53   :  { %s4722_s26 = scalar_lea.vmem %s141_s18, 16  ;;  %s4726_s28 = scalar_lea.vmem %s141_s18, 32 }
  0x54   :  { %p4723_p10 = scmp.ne.s32.totalorder %s141_s18, %s4722_s26  ;;  %p4727_p11 = scmp.lt.s32.totalorder %s141_s18, %s141_s18 }
  0x55   :  { %p4728_p12 = scmp.lt.s32.totalorder %s4726_s28, %s4722_s26 }
  0x57   :  { %p4729_p13 = por %p4728_p12, %p4727_p11 }
  0x59   :  { %p4730_p0 = pnand %p4729_p13, %p4723_p10 }
  0x5b   :  { %4733 = shalt.err (!%p4730_p0)
}
  0x5c   :  { %143 = dma.hbm_to_vmem [thread:$0]  %s5060_s8, 16, %s141_s18, [#allocation13]  }
  0x5d   :  { %s4742_s13 = scalar_lea.vmem %s163_s23, 16  ;;  %s4746_s1 = scalar_lea.vmem %s163_s23, 32 }
  0x5e   :  { %p4743_p1 = scmp.ne.s32.totalorder %s163_s23, %s4742_s13  ;;  %p4747_p2 = scmp.lt.s32.totalorder %s163_s23, %s163_s23 }
  0x5f   :  { %p4748_p3 = scmp.lt.s32.totalorder %s4746_s1, %s4742_s13 }
  0x61   :  { %p4749_p4 = por %p4748_p3, %p4747_p2 }
  0x63   :  { %p4750_p5 = pnand %p4749_p4, %p4743_p1 }
  0x65   :  { %4753 = shalt.err (!%p4750_p5)
}
  0x66   :  { %165 = dma.hbm_to_vmem [thread:$0]  %s5075_s24, 16, %s163_s23, [#allocation16]  }
  0x67   :  { %s4986_s25 = smov [#allocation18]   ;;  %s4987_s7 = smov [#allocation3]  }
  0x68   :  { %s184_s2 = sshll.u32 %s4986_s25, 4  ;;  %s86_s10 = sshll.u32 %s4987_s7, 4  ;;  %s185_s2 = int_to_ptr.vmem [resolvable:$true] %s184_s2  ;;  %s87_s10 = int_to_ptr.vmem [resolvable:$true] %s86_s10 }
  0x69   :  { %s4762_s11 = scalar_lea.vmem %s185_s2, 16  ;;  %s4766_s0 = scalar_lea.vmem %s185_s2, 32 }
  0x6a   :  { %p4763_p6 = scmp.ne.s32.totalorder %s185_s2, %s4762_s11  ;;  %p4767_p7 = scmp.lt.s32.totalorder %s185_s2, %s185_s2 }
  0x6b   :  { %p4768_p8 = scmp.lt.s32.totalorder %s4766_s0, %s4762_s11 }
  0x6d   :  { %p4769_p9 = por %p4768_p8, %p4767_p7 }
  0x6f   :  { %p4770_p10 = pnand %p4769_p9, %p4763_p6 }
  0x71   :  { %4773 = shalt.err (!%p4770_p10)
}
  0x72   :  { %187 = dma.hbm_to_vmem [thread:$0]  %s5090_s12, 16, %s185_s2, [#allocation19]  }
  0x73   :  { %s4782_s8 = scalar_lea.vmem %s87_s10, 32  ;;  %p4787_p12 = scmp.lt.s32.totalorder %s87_s10, %s87_s10 }
  0x74   :  { %p4783_p11 = scmp.ne.s32.totalorder %s87_s10, %s4782_s8  ;;  %p4788_p13 = scmp.lt.s32.totalorder %s4782_s8, %s4782_s8 }
  0x76   :  { %p4789_p0 = por %p4788_p13, %p4787_p12 }
  0x78   :  { %p4790_p1 = pnand %p4789_p0, %p4783_p11 }
  0x7a   :  { %4793 = shalt.err (!%p4790_p1)
}
  0x7b   :  { %89 = dma.hbm_to_vmem [thread:$0]  %s5025_s9, 32, %s87_s10, [#allocation4]  }
  0x7c   :  { %s4988_s24 = smov [#allocation8]   ;;  %s4989_s16 = smov [#allocation11]  }
  0x7d   :  { %s106_s15 = sshll.u32 %s4988_s24, 4  ;;  %s130_s18 = sshll.u32 %s4989_s16, 4  ;;  %s107_s15 = int_to_ptr.vmem [resolvable:$true] %s106_s15  ;;  %s131_s18 = int_to_ptr.vmem [resolvable:$true] %s130_s18 }
  0x7e   :  { %s4802_s22 = scalar_lea.vmem %s107_s15, 16  ;;  %s4806_s23 = scalar_lea.vmem %s107_s15, 32 }
  0x7f   :  { %p4803_p2 = scmp.ne.s32.totalorder %s107_s15, %s4802_s22  ;;  %p4807_p3 = scmp.lt.s32.totalorder %s107_s15, %s107_s15 }
  0x80   :  { %p4808_p4 = scmp.lt.s32.totalorder %s4806_s23, %s4802_s22 }
  0x82   :  { %p4809_p5 = por %p4808_p4, %p4807_p3 }
  0x84   :  { %p4810_p6 = pnand %p4809_p5, %p4803_p2 }
  0x86   :  { %4813 = shalt.err (!%p4810_p6)
}
  0x87   :  { %109 = dma.hbm_to_vmem [thread:$0]  %s5035_s17, 16, %s107_s15, [#allocation7]  }
  0x88   :  { %s4822_s12 = scalar_lea.vmem %s131_s18, 16  ;;  %s4826_s26 = scalar_lea.vmem %s131_s18, 32 }
  0x89   :  { %p4823_p7 = scmp.ne.s32.totalorder %s131_s18, %s4822_s12  ;;  %p4827_p8 = scmp.lt.s32.totalorder %s131_s18, %s131_s18 }
  0x8a   :  { %p4828_p9 = scmp.lt.s32.totalorder %s4826_s26, %s4822_s12 }
  0x8c   :  { %p4829_p10 = por %p4828_p9, %p4827_p8 }
  0x8e   :  { %p4830_p11 = pnand %p4829_p10, %p4823_p7 }
  0x90   :  { %4833 = shalt.err (!%p4830_p11)
}
  0x91   :  { %133 = dma.hbm_to_vmem [thread:$0]  %s5055_s3, 16, %s131_s18, [#allocation10]  }
  0x92   :  { %s4990_s9 = smov [#allocation14]   ;;  %s4991_s13 = smov [#allocation17]  }
  0x93   :  { %s150_s28 = sshll.u32 %s4990_s9, 4  ;;  %s174_s1 = sshll.u32 %s4991_s13, 4  ;;  %s151_s28 = int_to_ptr.vmem [resolvable:$true] %s150_s28  ;;  %s175_s1 = int_to_ptr.vmem [resolvable:$true] %s174_s1 }
  0x94   :  { %s4842_s25 = scalar_lea.vmem %s151_s28, 16  ;;  %s4846_s2 = scalar_lea.vmem %s151_s28, 32 }
  0x95   :  { %p4843_p12 = scmp.ne.s32.totalorder %s151_s28, %s4842_s25  ;;  %p4847_p13 = scmp.lt.s32.totalorder %s151_s28, %s151_s28 }
  0x96   :  { %p4848_p0 = scmp.lt.s32.totalorder %s4846_s2, %s4842_s25 }
  0x98   :  { %p4849_p1 = por %p4848_p0, %p4847_p13 }
  0x9a   :  { %p4850_p2 = pnand %p4849_p1, %p4843_p12 }
  0x9c   :  { %4853 = shalt.err (!%p4850_p2)
}
  0x9d   :  { %153 = dma.hbm_to_vmem [thread:$0]  %s5065_s14, 16, %s151_s28, [#allocation13]  }
  0x9e   :  { %s4862_s17 = scalar_lea.vmem %s175_s1, 16  ;;  %s4866_s7 = scalar_lea.vmem %s175_s1, 32 }
  0x9f   :  { %p4863_p3 = scmp.ne.s32.totalorder %s175_s1, %s4862_s17  ;;  %p4867_p4 = scmp.lt.s32.totalorder %s175_s1, %s175_s1 }
  0xa0   :  { %p4868_p5 = scmp.lt.s32.totalorder %s4866_s7, %s4862_s17 }
  0xa2   :  { %p4869_p6 = por %p4868_p5, %p4867_p4 }
  0xa4   :  { %p4870_p7 = pnand %p4869_p6, %p4863_p3 }
  0xa6   :  { %4873 = shalt.err (!%p4870_p7)
}
  0xa7   :  { %177 = dma.hbm_to_vmem [thread:$0]  %s5085_s6, 16, %s175_s1, [#allocation16]  }
  0xa8   :  { %s4992_s3 = smov [#allocation20]   ;;  %s4993_s11 = smov [#allocation21]  }
  0xa9   :  { %s194_s10 = sshll.u32 %s4992_s3, 4  ;;  %s206_s0 = sshll.u32 %s4993_s11, 4  ;;  %s195_s10 = int_to_ptr.vmem [resolvable:$true] %s194_s10  ;;  %s207_s0 = int_to_ptr.vmem [resolvable:$true] %s206_s0 }
  0xaa   :  { %s4882_s8 = scalar_lea.vmem %s195_s10, 16  ;;  %s4886_s24 = scalar_lea.vmem %s195_s10, 32 }
  0xab   :  { %p4883_p8 = scmp.ne.s32.totalorder %s195_s10, %s4882_s8  ;;  %p4887_p9 = scmp.lt.s32.totalorder %s195_s10, %s195_s10 }
  0xac   :  { %p4888_p10 = scmp.lt.s32.totalorder %s4886_s24, %s4882_s8 }
  0xae   :  { %p4889_p11 = por %p4888_p10, %p4887_p9 }
  0xb0   :  { %p4890_p12 = pnand %p4889_p11, %p4883_p8 }
  0xb2   :  { %4893 = shalt.err (!%p4890_p12)
}
  0xb3   :  { %197 = dma.hbm_to_vmem [thread:$0]  %s5095_s20, 16, %s195_s10, [#allocation19]  }
  0xb4   :  { %s4902_s14 = scalar_lea.vmem %s207_s0, 16  ;;  %s4906_s15 = scalar_lea.vmem %s207_s0, 32 }
  0xb5   :  { %p4903_p13 = scmp.ne.s32.totalorder %s207_s0, %s4902_s14  ;;  %p4907_p0 = scmp.lt.s32.totalorder %s207_s0, %s207_s0 }
  0xb6   :  { %p4908_p1 = scmp.lt.s32.totalorder %s4906_s15, %s4902_s14 }
  0xb8   :  { %p4909_p2 = por %p4908_p1, %p4907_p0 }
  0xba   :  { %p4910_p3 = pnand %p4909_p2, %p4903_p13 }
  0xbc   :  { %4913 = shalt.err (!%p4910_p3)
}
  0xbd   :  { %209 = dma.hbm_to_vmem [thread:$0]  %s5105_s4, 16, %s207_s0, [#allocation22]  }
  0xbe   :  { %4934 = dma.done.wait [#allocation4], 32  }
  0xbf   :  { %4935 = vsyncadd [#allocation4], 4294967264 }
  0xc0   :  { %4936 = dma.done.wait [#allocation7], 32  }
  0xc1   :  { %4937 = vsyncadd [#allocation7], 4294967264 }
  0xc2   :  { %4938 = dma.done.wait [#allocation10], 32  }
  0xc3   :  { %4939 = vsyncadd [#allocation10], 4294967264 }
  0xc4   :  { %4940 = dma.done.wait [#allocation13], 32  }
  0xc5   :  { %4941 = vsyncadd [#allocation13], 4294967264 }
  0xc6   :  { %4942 = dma.done.wait [#allocation16], 32  }
  0xc7   :  { %4943 = vsyncadd [#allocation16], 4294967264 }
  0xc8   :  { %4944 = dma.done.wait [#allocation19], 32  }
  0xc9   :  { %4945 = vsyncadd [#allocation19], 4294967264 }
  0xca   :  { %4946 = dma.done.wait [#allocation22], 16  }
  0xcb   :  { %4947 = vsyncadd [#allocation22], 4294967280  ;;  %vm279_vm0 = vcmask 261120   ;;  %v275_v0 = vld [vmem:[%s5020_s5] sm:$0xff]  ;;  %v276_v1 = vld [vmem:[%s5020_s5 + $0x8] sm:$0xff]  ;;  %v4994_v15 = vmov 0.0   ;;  %v336_v45 = vlaneseq }
  0xcc   :  { %v280_v2 = vsel %vm279_vm0, %v275_v0, 0.0  ;;  %v283_v3 = vsel %vm279_vm0, %v276_v1, 0.0  ;;  %v4556_v14 = vld [vmem:[%s5040_s21 + $0x8] sm:$0xff]   ;;  %4246 = vmatprep.subr.bf16.mxu0 %v4994_v15  ;;  %vm4995_vm1 = vmmov 0   ;;  %v4557_v16 = vld [vmem:[%s5040_s21] sm:$0xff]   ;;  %4254 = vmatprep.subr.mxu1 %v4994_v15  ;;  %s4996_s5 = smov 96  }
  0xcd   :  { %281 = vadd.xlane.f32.xlu0 %v280_v2  ;;  %4250 = vmatprep.mubr.msk.bf16.mxu0 %vm4995_vm1, %v4994_v15  ;;  %v4045_v25 = vld [vmem:[#allocation6] ss:$0 sm:$0xff]  ;;  %v4046_v29 = vld [vmem:[#allocation8] ss:$0 sm:$0xff]  ;;  %v4048_v34 = vld [vmem:[#allocation9] ss:$0 sm:$0xff] }
  0xce   :  { %4247 = vmatpush3.bf16.msra.mxu0 %v4556_v14  ;;  %4256 = vmatprep.mubr.msk.f32.mxu1 %vm4995_vm1, %v4994_v15  ;;  %vm428_vm2 = vcmask 64512   ;;  %v4997_v43 = vmov 1966171168   ;;  %v337_v47 = vshrl.u32 %v336_v45, 7  ;;  %s4998_s21 = smov 64   ;;  %s4999_s6 = smov 88  }
  0xcf   :  { %4248 = vmatprep.subr.bf16.mxu0 %v4994_v15  ;;  %v334_v44 = vunpack.c.l.s4 %v4997_v43  ;;  %v4047_v49 = vld.sshfl [vmem:[#allocation3] sm:$0x11 pattern:$0x75316420]  ;;  %s5000_s20 = smov 120   ;;  %s5001_s4 = smov 56  }
  0xd0   :  { %v417_v51 = vsub.s32 0, %v337_v47  ;;  %v332_v52 = vcombine.high %v4047_v49, %v4047_v49  ;;  %s5002_s16 = smov 80   ;;  %s5003_s18 = smov 112   ;;  %vm1094_vm3 = vcmask 130112   ;;  %vm1435_vm4 = vcmask 195712  }
  0xd1   :  { %284 = vadd.xlane.f32.xlu0 %v283_v3  ;;  %v335_v46 = vunpack.c.0.s8 %v334_v44  ;;  %s5004_s22 = smov 48   ;;  %s5005_s23 = smov 72   ;;  %vm1776_vm5 = vcmask 261312   ;;  %vm2013_vm6 = vcmask 523264   ;;  %vm3864_vm7 = vcmask 1041409  }
  0xd2   :  { %4249 = vmatpush3.bf16.msra.mxu0 %v4557_v16  ;;  %s5006_s12 = smov 104   ;;  %s5007_s26 = smov 40   ;;  %vm3990_vm8 = vcmask 17408  }
  0xd3   :  { %4269 = vmatprep.subr.mxu0 %v4994_v15  ;;  %v338_v48 = vsub.s32 %v335_v46, %v337_v47  ;;  %s5008_s9 = smov 8   ;;  %s5009_s28 = smov 16  }
  0xd4   :  { %s5680_s13 = sld [smem:[#allocation32_spill]]  ;;  %s5010_s1 = smov 24  }
  0xd5   :  { %v339_v50 = vrot.slane %v4047_v49, %v338_v48  ;;  %v346_v54 = vrot.slane %v332_v52, %v338_v48  ;;  %s5681_s25 = sld [smem:[#allocation33_spill]] }
  0xd6   :  { %s5682_s2 = sld [smem:[#allocation34_spill]] }
  0xd7   :  { %v5239_v53 = vrot.slane %v339_v50, %v417_v51  ;;  %v5242_v57 = vrot.slane %v346_v54, %v417_v51  ;;  %s5683_s17 = sld [smem:[#allocation35_spill]] }
  0xd8   :  { %s5684_s7 = sld [smem:[#allocation36_spill]] }
  0xd9   :  { %s5685_s3 = sld [smem:[#allocation37_spill]] }
  0xda   :  { %s5686_s10 = sld [smem:[#allocation40_spill]] }
  0xdb   :  { %s5687_s11 = sld [smem:[#allocation38_spill]] }
  0xdc   :  { %s5688_s0 = sld [smem:[#allocation39_spill]] }
  0xdd   :  { %s5689_s8 = sld [smem:[#allocation42_spill]] }
  0xde   :  { %s5690_s24 = sld [smem:[#allocation41_spill]] }
  0xdf   :  { %s5691_s14 = sld [smem:[#allocation43_spill]] }
  0xe0   :  { %s5692_s15 = sld [smem:[#allocation46_spill]] }
 0x156   :  { %v282_v4 = vpop.xlane.xlu0 %281 }
 0x157   :  { %v287_v5 = vmul.f32 0.03125, %v282_v4 }
 0x159   :  { %v289_v6 = vsub.f32 %v275_v0, %v287_v5 }
 0x15a   :  { %v285_v7 = vpop.xlane.xlu0 %284 }
 0x15b   :  { %v288_v8 = vmul.f32 0.03125, %v285_v7  ;;  %v291_v9 = vmul.f32 %v289_v6, %v289_v6 }
 0x15d   :  { %v290_v10 = vsub.f32 %v276_v1, %v288_v8  ;;  %v293_v11 = vsel %vm279_vm0, %v291_v9, 0.0 }
 0x15e   :  { %294 = vadd.xlane.f32.xlu1 %v293_v11 }
 0x15f   :  { %v292_v12 = vmul.f32 %v290_v10, %v290_v10 }
 0x161   :  { %v296_v13 = vsel %vm279_vm0, %v292_v12, 0.0 }
 0x162   :  { %297 = vadd.xlane.f32.xlu1 %v296_v13 }
 0x1e7   :  { %v295_v17 = vpop.xlane.xlu1 %294 }
 0x1e8   :  { %v299_v18 = vmul.f32 0.03125, %v295_v17 }
 0x1ea   :  { %v301_v19 = vadd.f32 1e-12, %v299_v18 }
 0x1eb   :  { %v298_v20 = vpop.xlane.xlu1 %297 }
 0x1ec   :  { %4580 = vrsqrt.f32 %v301_v19  ;;  %v300_v21 = vmul.f32 0.03125, %v298_v20 }
 0x1ee   :  { %v302_v22 = vadd.f32 1e-12, %v300_v21 }
 0x1f0   :  { %4582 = vrsqrt.f32 %v302_v22 }
 0x1f9   :  { %v4581_v23 = vpop.eup %4580 }
 0x1fa   :  { %v305_v24 = vmul.f32 %v4581_v23, %v289_v6 }
 0x1fc   :  { %v313_v28 = vmul.f32 %v4045_v25, %v305_v24 }
 0x1fd   :  { %v4583_v26 = vpop.eup %4582 }
 0x1fe   :  { %v306_v27 = vmul.f32 %v4583_v26, %v290_v10  ;;  %v5210_v31 = vadd.f32 %v4046_v29, %v313_v28 }
 0x200   :  { %v314_v30 = vmul.f32 %v4045_v25, %v306_v27 }
 0x202   :  { %v5212_v32 = vadd.f32 %v4046_v29, %v314_v30 }
 0x204   :  { %v347_v33 = vpack.c.bf16 %v5212_v32, %v5210_v31 }
 0x206   :  { %4251 = vmatmul.mubr.msk.bf16.vlgmr.msra.gmra.mxu0 %vm279_vm0, %v347_v33 }
 0x207   :  { %4271 = vmatprep.mubr.msk.f32.mxu0 %vm4995_vm1, %v4994_v15 }
 0x2c6   :  { %v408_v35 = vpop.f32.mrf.mxu0 }
 0x2c7   :  { %v5219_v36 = vadd.f32 %v4048_v34, %v408_v35 }
 0x2c8   :  { %v4252_v37 = vpop.f32.mrf.mxu0 }
 0x2c9   :  { %426 = vrot.lane.b32.xlu0 %v5219_v36, %s4996_s5 }
 0x2ca   :  { %v411_v38 = vpop.f32.mrf.mxu0 }
 0x2cb   :  { %v5223_v39 = vadd.f32 %v4048_v34, %v411_v38 }
 0x2cc   :  { %v4253_v40 = vpop.f32.mrf.mxu0 }
 0x2cd   :  { %504 = vrot.lane.b32.xlu1 %v5223_v39, %s4996_s5 }
 0x33b   :  { %v427_v41 = vpop.permute.xlu0 %426 }
 0x33c   :  { %4255 = vmatpush3.xpose.msk.msra.mxu1 %vm428_vm2, %v427_v41 }
 0x33d   :  { %4259 = vmatprep.subr.mxu1 %v4994_v15 }
 0x33f   :  { %4257 = vmatmul.mubr.msk.f32.vlgmr.msra.gmra.mxu1 %vm428_vm2, %v5219_v36  ;;  %v505_v42 = vpop.permute.xlu1 %504 }
 0x340   :  { %4260 = vmatpush3.xpose.msk.msra.mxu1 %vm428_vm2, %v505_v42  ;;  %4261 = vmatprep.mubr.msk.f32.mxu1 %vm4995_vm1, %v4994_v15 }
 0x341   :  { %4264 = vmatprep.subr.mxu1 %v4994_v15 }
 0x343   :  { %4262 = vmatmul.mubr.msk.f32.vlgmr.msra.gmra.mxu1 %vm428_vm2, %v5223_v39 }
 0x344   :  { %4266 = vmatprep.mubr.msk.f32.mxu1 %vm4995_vm1, %v4994_v15 }
 0x3ff   :  { %v499_v55 = vpop.f32.mrf.mxu1 }
 0x400   :  { %v500_v56 = vadd.f32 %v499_v55, %v5239_v53 }
 0x401   :  { %v4258_v58 = vpop.f32.mrf.mxu1 }
 0x402   :  { %v580_v59 = vsel %vm428_vm2, %v500_v56, -inf }
 0x403   :  { %581 = vmax.xlane.f32.xlu1 %v580_v59  ;;  %v576_v60 = vpop.f32.mrf.mxu1 }
 0x404   :  { %v577_v61 = vadd.f32 %v576_v60, %v5242_v57 }
 0x405   :  { %v4263_v62 = vpop.f32.mrf.mxu1 }
 0x406   :  { %v583_v63 = vsel %vm428_vm2, %v577_v61, -inf }
 0x407   :  { %584 = vmax.xlane.f32.xlu0 %v583_v63 }
 0x414   :  { %678 = vrot.lane.b32.xlu1 %v5223_v39, %s4998_s21 }
 0x418   :  { %758 = vrot.lane.b32.xlu1 %v5219_v36, %s4999_s6 }
 0x41c   :  { %836 = vrot.lane.b32.xlu1 %v5223_v39, %s4999_s6 }
 0x48c   :  { %v582_v0 = vpop.xlane.xlu1 %581 }
 0x48d   :  { %v586_v1 = vsub.f32 %v500_v56, %v582_v0 }
 0x48f   :  { %v588_v2 = vmul.f32 1.442695, %v586_v1 }
 0x490   :  { %v585_v3 = vpop.xlane.xlu0 %584  ;;  %v679_v4 = vpop.permute.xlu1 %678 }
 0x491   :  { %4584 = vpow2.f32 %v588_v2  ;;  %v587_v5 = vsub.f32 %v577_v61, %v585_v3  ;;  %4270 = vmatpush3.msra.mxu0 %v679_v4 }
 0x492   :  { %4279 = vmatprep.subr.mxu0 %v4994_v15 }
 0x493   :  { %v590_v6 = vmul.f32 1.442695, %v587_v5 }
 0x494   :  { %v759_v11 = vpop.permute.xlu1 %758 }
 0x495   :  { %4586 = vpow2.f32 %v590_v6 }
 0x498   :  { %v837_v12 = vpop.permute.xlu1 %836 }
 0x49e   :  { %v4585_v7 = vpop.eup %4584 }
 0x49f   :  { %v592_v8 = vsel %vm428_vm2, %v4585_v7, 0.0 }
 0x4a0   :  { %593 = vadd.xlane.f32.xlu0 %v592_v8 }
 0x4a2   :  { %v4587_v9 = vpop.eup %4586 }
 0x4a3   :  { %v595_v10 = vsel %vm428_vm2, %v4587_v9, 0.0 }
 0x4a4   :  { %596 = vadd.xlane.f32.xlu1 %v595_v10 }
 0x4b5   :  { %834 = vrot.lane.b32.xlu1 %v5223_v39, %s5000_s20 }
 0x4b6   :  { %602 = vrot.lane.b32.xlu0 %v5219_v36, %s4998_s21 }
 0x4ba   :  { %756 = vrot.lane.b32.xlu0 %v5219_v36, %s5000_s20 }
 0x529   :  { %v594_v13 = vpop.xlane.xlu0 %593 }
 0x52a   :  { %4588 = vrcp.f32 %v594_v13 }
 0x52d   :  { %v603_v14 = vpop.permute.xlu0 %602  ;;  %v597_v16 = vpop.xlane.xlu1 %596 }
 0x52e   :  { %4590 = vrcp.f32 %v597_v16  ;;  %4265 = vmatpush3.msra.mxu1 %v603_v14 }
 0x52f   :  { %4274 = vmatprep.subr.mxu1 %v4994_v15 }
 0x531   :  { %v757_v21 = vpop.permute.xlu0 %756  ;;  %v835_v22 = vpop.permute.xlu1 %834 }
 0x537   :  { %v4589_v17 = vpop.eup %4588 }
 0x538   :  { %v600_v18 = vmul.f32 %v4589_v17, %v4585_v7 }
 0x53a   :  { %4267 = vmatmul.mubr.msk.f32.vlgmr.msra.gmra.mxu1 %vm428_vm2, %v600_v18 }
 0x53b   :  { %v4591_v19 = vpop.eup %4590  ;;  %4275 = vmatpush3.xpose.msk.msra.mxu1 %vm428_vm2, %v759_v11  ;;  %4276 = vmatprep.mubr.msk.f32.mxu1 %vm4995_vm1, %v4994_v15 }
 0x53c   :  { %v601_v20 = vmul.f32 %v4591_v19, %v4587_v9  ;;  %4284 = vmatprep.subr.mxu1 %v4994_v15 }
 0x53e   :  { %4272 = vmatmul.mubr.msk.f32.vlgmr.msra.gmra.mxu0 %vm428_vm2, %v601_v20  ;;  %4277 = vmatmul.mubr.msk.f32.vlgmr.msra.gmra.mxu1 %vm428_vm2, %v757_v21 }
 0x53f   :  { %4280 = vmatpush3.xpose.msk.msra.mxu0 %vm428_vm2, %v837_v12  ;;  %4281 = vmatprep.mubr.msk.f32.mxu0 %vm4995_vm1, %v4994_v15 }
 0x540   :  { %4289 = vmatprep.subr.mxu0 %v4994_v15  ;;  %4286 = vmatprep.mubr.msk.f32.mxu1 %vm4995_vm1, %v4994_v15 }
 0x542   :  { %4282 = vmatmul.mubr.msk.f32.vlgmr.msra.gmra.mxu0 %vm428_vm2, %v835_v22 }
 0x543   :  { %4291 = vmatprep.mubr.msk.f32.mxu0 %vm4995_vm1, %v4994_v15 }
 0x5fa   :  { %v674_v23 = vpop.f32.mrf.mxu1 }
 0x5fb   :  { %754 = vst.msk [vmem:[#allocation2] sm:$0xff] %vm428_vm2, %v674_v23 }
 0x5fc   :  { %v4268_v24 = vpop.f32.mrf.mxu1 }
 0x5fe   :  { %v750_v25 = vpop.f32.mrf.mxu0  ;;  %v830_v26 = vpop.f32.mrf.mxu1 }
 0x5ff   :  { %755 = vst.msk [vmem:[#allocation2 + $0x8] sm:$0xff] %vm428_vm2, %v750_v25  ;;  %v831_v27 = vadd.f32 %v830_v26, %v5239_v53 }
 0x600   :  { %v4273_v28 = vpop.f32.mrf.mxu0  ;;  %v4278_v29 = vpop.f32.mrf.mxu1 }
 0x601   :  { %v912_v30 = vsel %vm428_vm2, %v831_v27, -inf }
 0x602   :  { %913 = vmax.xlane.f32.xlu0 %v912_v30  ;;  %v908_v33 = vpop.f32.mrf.mxu0 }
 0x603   :  { %v909_v34 = vadd.f32 %v908_v33, %v5242_v57 }
 0x604   :  { %v4283_v35 = vpop.f32.mrf.mxu0 }
 0x605   :  { %v915_v37 = vsel %vm428_vm2, %v909_v34, -inf }
 0x606   :  { %916 = vmax.xlane.f32.xlu1 %v915_v37 }
 0x617   :  { %1010 = vrot.lane.b32.xlu1 %v5223_v39, %s5001_s4 }
 0x61b   :  { %1099 = vrot.lane.b32.xlu1 %v5219_v36, %s5002_s16 }
 0x61f   :  { %1177 = vrot.lane.b32.xlu1 %v5223_v39, %s5002_s16 }
 0x623   :  { %1175 = vrot.lane.b32.xlu1 %v5223_v39, %s5003_s18 }
 0x68b   :  { %v914_v38 = vpop.xlane.xlu0 %913 }
 0x68c   :  { %v918_v40 = vsub.f32 %v831_v27, %v914_v38 }
 0x68e   :  { %v920_v41 = vmul.f32 1.442695, %v918_v40 }
 0x68f   :  { %v917_v42 = vpop.xlane.xlu1 %916 }
 0x690   :  { %4592 = vpow2.f32 %v920_v41  ;;  %v919_v43 = vsub.f32 %v909_v34, %v917_v42 }
 0x692   :  { %v922_v44 = vmul.f32 1.442695, %v919_v43 }
 0x693   :  { %v1011_v45 = vpop.permute.xlu1 %1010 }
 0x694   :  { %4594 = vpow2.f32 %v922_v44  ;;  %4290 = vmatpush3.msra.mxu0 %v1011_v45 }
 0x695   :  { %4299 = vmatprep.subr.mxu0 %v4994_v15 }
 0x697   :  { %v1100_v54 = vpop.permute.xlu1 %1099 }
 0x69b   :  { %v1178_v59 = vpop.permute.xlu1 %1177 }
 0x69d   :  { %v4593_v46 = vpop.eup %4592 }
 0x69e   :  { %v924_v47 = vsel %vm428_vm2, %v4593_v46, 0.0 }
 0x69f   :  { %925 = vadd.xlane.f32.xlu0 %v924_v47  ;;  %v1176_v62 = vpop.permute.xlu1 %1175 }
 0x6a1   :  { %v4595_v48 = vpop.eup %4594 }
 0x6a2   :  { %v927_v49 = vsel %vm428_vm2, %v4595_v48, 0.0 }
 0x6a3   :  { %928 = vadd.xlane.f32.xlu0 %v927_v49 }
 0x6b9   :  { %934 = vrot.lane.b32.xlu0 %v5219_v36, %s5001_s4 }
 0x6bd   :  { %1097 = vrot.lane.b32.xlu0 %v5219_v36, %s5003_s18 }
 0x728   :  { %v926_v50 = vpop.xlane.xlu0 %925 }
 0x729   :  { %4596 = vrcp.f32 %v926_v50 }
 0x72c   :  { %v929_v51 = vpop.xlane.xlu0 %928 }
 0x72d   :  { %4598 = vrcp.f32 %v929_v51 }
 0x730   :  { %v935_v52 = vpop.permute.xlu0 %934 }
 0x731   :  { %4285 = vmatpush3.msra.mxu1 %v935_v52 }
 0x732   :  { %4294 = vmatprep.subr.mxu1 %v4994_v15 }
 0x734   :  { %v1098_v61 = vpop.permute.xlu0 %1097 }
 0x736   :  { %v4597_v55 = vpop.eup %4596 }
 0x737   :  { %v932_v56 = vmul.f32 %v4597_v55, %v4593_v46 }
 0x739   :  { %4287 = vmatmul.mubr.msk.f32.vlgmr.msra.gmra.mxu1 %vm428_vm2, %v932_v56 }
 0x73a   :  { %v4599_v58 = vpop.eup %4598  ;;  %4295 = vmatpush3.xpose.msk.msra.mxu1 %vm428_vm2, %v1100_v54  ;;  %4296 = vmatprep.mubr.msk.f32.mxu1 %vm4995_vm1, %v4994_v15 }
 0x73b   :  { %v933_v60 = vmul.f32 %v4599_v58, %v4595_v48  ;;  %4304 = vmatprep.subr.mxu1 %v4994_v15 }
 0x73d   :  { %4292 = vmatmul.mubr.msk.f32.vlgmr.msra.gmra.mxu0 %vm428_vm2, %v933_v60  ;;  %4297 = vmatmul.mubr.msk.f32.vlgmr.msra.gmra.mxu1 %vm428_vm2, %v1098_v61 }
 0x73e   :  { %4300 = vmatpush3.xpose.msk.msra.mxu0 %vm428_vm2, %v1178_v59  ;;  %4301 = vmatprep.mubr.msk.f32.mxu0 %vm4995_vm1, %v4994_v15 }
 0x73f   :  { %4309 = vmatprep.subr.mxu0 %v4994_v15  ;;  %4306 = vmatprep.mubr.msk.f32.mxu1 %vm4995_vm1, %v4994_v15 }
 0x741   :  { %4302 = vmatmul.mubr.msk.f32.vlgmr.msra.gmra.mxu0 %vm428_vm2, %v1176_v62 }
 0x742   :  { %4311 = vmatprep.mubr.msk.f32.mxu0 %vm4995_vm1, %v4994_v15 }
 0x7f9   :  { %v5317_v63 = vpop.f32.mrf.mxu1 }
 0x7fb   :  { %v4288_v0 = vpop.f32.mrf.mxu1 }
 0x7fd   :  { %v5319_v1 = vpop.f32.mrf.mxu0  ;;  %v1171_v2 = vpop.f32.mrf.mxu1 }
 0x7fe   :  { %v1172_v3 = vadd.f32 %v1171_v2, %v5239_v53 }
 0x7ff   :  { %v4293_v4 = vpop.f32.mrf.mxu0  ;;  %v4298_v5 = vpop.f32.mrf.mxu1 }
 0x800   :  { %v1253_v6 = vsel %vm428_vm2, %v1172_v3, -inf }
 0x801   :  { %1254 = vmax.xlane.f32.xlu0 %v1253_v6  ;;  %v1249_v7 = vpop.f32.mrf.mxu0 }
 0x802   :  { %v1250_v8 = vadd.f32 %v1249_v7, %v5242_v57 }
 0x803   :  { %v4303_v9 = vpop.f32.mrf.mxu0 }
 0x804   :  { %v1256_v10 = vsel %vm428_vm2, %v1250_v8, -inf  ;;  %v4559_v9 = vld [vmem:[%s5680_s13] sm:$0xff]  }
 0x805   :  { %1257 = vmax.xlane.f32.xlu1 %v1256_v10 }
 0x816   :  { %1351 = vrot.lane.b32.xlu1 %v5223_v39, %s5004_s22 }
 0x81a   :  { %1440 = vrot.lane.b32.xlu1 %v5219_v36, %s5005_s23 }
 0x81e   :  { %1518 = vrot.lane.b32.xlu1 %v5223_v39, %s5005_s23 }
 0x822   :  { %1516 = vrot.lane.b32.xlu1 %v5223_v39, %s5006_s12 }
 0x88a   :  { %v1255_v11 = vpop.xlane.xlu0 %1254 }
 0x88b   :  { %v1259_v12 = vsub.f32 %v1172_v3, %v1255_v11 }
 0x88d   :  { %v1261_v13 = vmul.f32 1.442695, %v1259_v12 }
 0x88e   :  { %v1258_v14 = vpop.xlane.xlu1 %1257 }
 0x88f   :  { %4600 = vpow2.f32 %v1261_v13  ;;  %v1260_v16 = vsub.f32 %v1250_v8, %v1258_v14  ;;  %v4558_v8 = vld [vmem:[%s5680_s13 + $0x8] sm:$0xff]  }
 0x891   :  { %v1263_v17 = vmul.f32 1.442695, %v1260_v16 }
 0x892   :  { %v1352_v18 = vpop.permute.xlu1 %1351 }
 0x893   :  { %4602 = vpow2.f32 %v1263_v17  ;;  %4310 = vmatpush3.msra.mxu0 %v1352_v18 }
 0x894   :  { %4319 = vmatprep.subr.mxu0 %v4994_v15 }
 0x896   :  { %v1441_v26 = vpop.permute.xlu1 %1440 }
 0x89a   :  { %v1519_v30 = vpop.permute.xlu1 %1518 }
 0x89c   :  { %v4601_v19 = vpop.eup %4600 }
 0x89d   :  { %v1265_v20 = vsel %vm428_vm2, %v4601_v19, 0.0 }
 0x89e   :  { %1266 = vadd.xlane.f32.xlu0 %v1265_v20  ;;  %v1517_v35 = vpop.permute.xlu1 %1516  ;;  %v4076_v20 = vld [vmem:[#allocation11] ss:$0 sm:$0xff] }
 0x8a0   :  { %v4603_v21 = vpop.eup %4602 }
 0x8a1   :  { %v1268_v22 = vsel %vm428_vm2, %v4603_v21, 0.0 }
 0x8a2   :  { %1269 = vadd.xlane.f32.xlu0 %v1268_v22 }
 0x8b8   :  { %1275 = vrot.lane.b32.xlu0 %v5219_v36, %s5004_s22 }
 0x8bc   :  { %1438 = vrot.lane.b32.xlu0 %v5219_v36, %s5006_s12 }
 0x927   :  { %v1267_v23 = vpop.xlane.xlu0 %1266 }
 0x928   :  { %4604 = vrcp.f32 %v1267_v23 }
 0x92b   :  { %v1270_v24 = vpop.xlane.xlu0 %1269 }
 0x92c   :  { %4606 = vrcp.f32 %v1270_v24 }
 0x92f   :  { %v1276_v25 = vpop.permute.xlu0 %1275 }
 0x930   :  { %4305 = vmatpush3.msra.mxu1 %v1276_v25 }
 0x931   :  { %4314 = vmatprep.subr.mxu1 %v4994_v15 }
 0x933   :  { %v1439_v34 = vpop.permute.xlu0 %1438 }
 0x935   :  { %v4605_v27 = vpop.eup %4604 }
 0x936   :  { %v1273_v28 = vmul.f32 %v4605_v27, %v4601_v19 }
 0x938   :  { %4307 = vmatmul.mubr.msk.f32.vlgmr.msra.gmra.mxu1 %vm428_vm2, %v1273_v28 }
 0x939   :  { %v4607_v29 = vpop.eup %4606  ;;  %4315 = vmatpush3.xpose.msk.msra.mxu1 %vm428_vm2, %v1441_v26  ;;  %4316 = vmatprep.mubr.msk.f32.mxu1 %vm4995_vm1, %v4994_v15 }
 0x93a   :  { %v1274_v33 = vmul.f32 %v4607_v29, %v4603_v21  ;;  %4324 = vmatprep.subr.mxu1 %v4994_v15 }
 0x93c   :  { %4312 = vmatmul.mubr.msk.f32.vlgmr.msra.gmra.mxu0 %vm428_vm2, %v1274_v33  ;;  %4317 = vmatmul.mubr.msk.f32.vlgmr.msra.gmra.mxu1 %vm428_vm2, %v1439_v34 }
 0x93d   :  { %4320 = vmatpush3.xpose.msk.msra.mxu0 %vm428_vm2, %v1519_v30  ;;  %4321 = vmatprep.mubr.msk.f32.mxu0 %vm4995_vm1, %v4994_v15 }
 0x93e   :  { %4329 = vmatprep.subr.mxu0 %v4994_v15  ;;  %4326 = vmatprep.mubr.msk.f32.mxu1 %vm4995_vm1, %v4994_v15 }
 0x940   :  { %4322 = vmatmul.mubr.msk.f32.vlgmr.msra.gmra.mxu0 %vm428_vm2, %v1517_v35 }
 0x941   :  { %4331 = vmatprep.mubr.msk.f32.mxu0 %vm4995_vm1, %v4994_v15 }
 0x9f8   :  { %v1347_v37 = vpop.f32.mrf.mxu1 }
 0x9fa   :  { %v4308_v38 = vpop.f32.mrf.mxu1 }
 0x9fc   :  { %v1423_v40 = vpop.f32.mrf.mxu0  ;;  %v1512_v41 = vpop.f32.mrf.mxu1 }
 0x9fd   :  { %v1513_v42 = vadd.f32 %v1512_v41, %v5239_v53 }
 0x9fe   :  { %v4313_v43 = vpop.f32.mrf.mxu0  ;;  %v4318_v44 = vpop.f32.mrf.mxu1 }
 0x9ff   :  { %v1594_v45 = vsel %vm428_vm2, %v1513_v42, -inf  ;;  %v4560_v44 = vld [vmem:[%s5681_s25 + $0x8] sm:$0xff]  }
 0xa00   :  { %1595 = vmax.xlane.f32.xlu0 %v1594_v45  ;;  %v1590_v46 = vpop.f32.mrf.mxu0 }
 0xa01   :  { %v1591_v47 = vadd.f32 %v1590_v46, %v5242_v57 }
 0xa02   :  { %v4323_v48 = vpop.f32.mrf.mxu0 }
 0xa03   :  { %v1597_v49 = vsel %vm428_vm2, %v1591_v47, -inf }
 0xa04   :  { %1598 = vmax.xlane.f32.xlu1 %v1597_v49 }
 0xa15   :  { %1692 = vrot.lane.b32.xlu1 %v5223_v39, %s5007_s26 }
 0xa19   :  { %1088 = vrot.lane.b32.xlu1 %v5317_v63, %s5008_s9 }
 0xa1d   :  { %1090 = vrot.lane.b32.xlu1 %v5319_v1, %s5008_s9 }
 0xa21   :  { %1431 = vrot.lane.b32.xlu1 %v1423_v40, %s5009_s28 }
 0xa89   :  { %v1596_v50 = vpop.xlane.xlu0 %1595 }
 0xa8a   :  { %v1600_v51 = vsub.f32 %v1513_v42, %v1596_v50 }
 0xa8c   :  { %v1602_v52 = vmul.f32 1.442695, %v1600_v51 }
 0xa8d   :  { %v1599_v54 = vpop.xlane.xlu1 %1598 }
 0xa8e   :  { %4608 = vpow2.f32 %v1602_v52  ;;  %v1601_v55 = vsub.f32 %v1591_v47, %v1599_v54  ;;  %v4080_v54 = vld [vmem:[#allocation12] ss:$0 sm:$0xff] }
 0xa90   :  { %v1604_v56 = vmul.f32 1.442695, %v1601_v55 }
 0xa91   :  { %v1693_v58 = vpop.permute.xlu1 %1692 }
 0xa92   :  { %4610 = vpow2.f32 %v1604_v56  ;;  %4330 = vmatpush3.msra.mxu0 %v1693_v58 }
 0xa93   :  { %4342 = vmatprep.subr.bf16.mxu0 %v4994_v15 }
 0xa95   :  { %v1089_v39 = vpop.permute.xlu1 %1088 }
 0xa96   :  { %1095 = vst.msk [vmem:[#allocation2] sm:$0xff] %vm1094_vm3, %v1089_v39  ;;  %v4081_v39 = vld [vmem:[#allocation14] ss:$0 sm:$0xff] }
 0xa99   :  { %v1091_v59 = vpop.permute.xlu1 %1090 }
 0xa9a   :  { %1096 = vst.msk [vmem:[#allocation2 + $0x8] sm:$0xff] %vm1094_vm3, %v1091_v59 }
 0xa9b   :  { %v4609_v60 = vpop.eup %4608 }
 0xa9c   :  { %v1606_v61 = vsel %vm428_vm2, %v4609_v60, 0.0 }
 0xa9d   :  { %1607 = vadd.xlane.f32.xlu0 %v1606_v61  ;;  %v1432_v62 = vpop.permute.xlu1 %1431 }
 0xa9e   :  { %1437 = vst.msk [vmem:[#allocation2 + $0x8] sm:$0xff] %vm1435_vm4, %v1432_v62 }
 0xa9f   :  { %v4611_v63 = vpop.eup %4610 }
 0xaa0   :  { %v1609_v0 = vsel %vm428_vm2, %v4611_v63, 0.0 }
 0xaa1   :  { %1610 = vadd.xlane.f32.xlu0 %v1609_v0  ;;  %v4563_v0 = vld [vmem:[%s5682_s2 + $0x10] sm:$0xff]  }
 0xab7   :  { %1616 = vrot.lane.b32.xlu0 %v5219_v36, %s5007_s26 }
 0xabb   :  { %1429 = vrot.lane.b32.xlu0 %v1347_v37, %s5009_s28 }
 0xb26   :  { %v1608_v1 = vpop.xlane.xlu0 %1607 }
 0xb27   :  { %4612 = vrcp.f32 %v1608_v1  ;;  %v4564_v1 = vld [vmem:[%s5682_s2 + $0x8] sm:$0xff]  }
 0xb2a   :  { %v1611_v2 = vpop.xlane.xlu0 %1610 }
 0xb2b   :  { %4614 = vrcp.f32 %v1611_v2  ;;  %v4565_v2 = vld [vmem:[%s5682_s2] sm:$0xff]  }
 0xb2e   :  { %v1617_v3 = vpop.permute.xlu0 %1616 }
 0xb2f   :  { %4325 = vmatpush3.msra.mxu1 %v1617_v3  ;;  %v4082_v3 = vld [vmem:[#allocation15] ss:$0 sm:$0xff] }
 0xb30   :  { %4334 = vmatprep.subr.bf16.mxu1 %v4994_v15 }
 0xb32   :  { %v1430_v4 = vpop.permute.xlu0 %1429 }
 0xb33   :  { %1436 = vst.msk [vmem:[#allocation2] sm:$0xff] %vm1435_vm4, %v1430_v4 }
 0xb34   :  { %v4613_v5 = vpop.eup %4612 }
 0xb35   :  { %v1614_v6 = vmul.f32 %v4613_v5, %v4609_v60 }
 0xb37   :  { %4327 = vmatmul.mubr.msk.f32.vlgmr.msra.gmra.mxu1 %vm428_vm2, %v1614_v6 }
 0xb38   :  { %v4615_v36 = vpop.eup %4614  ;;  %4338 = vmatprep.mubr.msk.bf16.mxu1 %vm4995_vm1, %v4994_v15  ;;  %4335 = vmatpush3.bf16.msra.mxu1 %v4558_v8 }
 0xb39   :  { %v1615_v7 = vmul.f32 %v4615_v36, %v4611_v63  ;;  %4336 = vmatprep.subr.bf16.mxu1 %v4994_v15  ;;  %v4562_v63 = vld [vmem:[%s5682_s2 + $0x18] sm:$0xff]  }
 0xb3b   :  { %4332 = vmatmul.mubr.msk.f32.vlgmr.msra.gmra.mxu0 %vm428_vm2, %v1615_v7 }
 0xb3c   :  { %4346 = vmatprep.mubr.msk.bf16.mxu0 %vm4995_vm1, %v4994_v15  ;;  %4337 = vmatpush3.bf16.msra.mxu1 %v4559_v9 }
 0xb3d   :  { %4350 = vmatprep.subr.bf16.mxu1 %v4994_v15  ;;  %4343 = vmatpush3.bf16.msra.mxu0 %v4560_v44 }
 0xb3e   :  { %4344 = vmatprep.subr.bf16.mxu0 %v4994_v15 }
 0xbf7   :  { %v1688_v10 = vpop.f32.mrf.mxu1 }
 0xbf8   :  { %1770 = vrot.lane.b32.xlu0 %v1688_v10, %s5010_s1 }
 0xbf9   :  { %v4328_v11 = vpop.f32.mrf.mxu1 }
 0xbfb   :  { %v1764_v12 = vpop.f32.mrf.mxu0 }
 0xbfc   :  { %1772 = vrot.lane.b32.xlu1 %v1764_v12, %s5010_s1 }
 0xbfd   :  { %v4333_v13 = vpop.f32.mrf.mxu0 }
 0xc6a   :  { %v1771_v14 = vpop.permute.xlu0 %1770 }
 0xc6b   :  { %1777 = vst.msk [vmem:[#allocation2] sm:$0xff] %vm1776_vm5, %v1771_v14 }
 0xc6e   :  { %v1773_v16 = vpop.permute.xlu1 %1772 }
 0xc6f   :  { %1778 = vst.msk [vmem:[#allocation2 + $0x8] sm:$0xff] %vm1776_vm5, %v1773_v16 }
 0xc72   :  { %v1779_v17 = vld [vmem:[#allocation2] sm:$0xff] }
 0xc76   :  { %v1780_v18 = vld [vmem:[#allocation2 + $0x8] sm:$0xff] }
 0xc77   :  { %v1781_v19 = vpack.c.bf16 %v1780_v18, %v1779_v17 }
 0xc79   :  { %4339 = vmatmul.mubr.msk.bf16.vlgmr.msra.gmra.mxu1 %vm279_vm0, %v1781_v19 }
 0xc7a   :  { %4358 = vmatprep.mubr.msk.bf16.mxu1 %vm4995_vm1, %v4994_v15  ;;  %4351 = vmatpush3.bf16.msra.mxu1 %v4562_v63 }
 0xc7b   :  { %4352 = vmatprep.subr.bf16.mxu1 %v4994_v15 }
 0xc7e   :  { %4353 = vmatpush3.bf16.msra.mxu1 %v4563_v0  ;;  %v4094_v0 = vld [vmem:[#allocation21] ss:$0 sm:$0xff] }
 0xc7f   :  { %4354 = vmatprep.subr.bf16.mxu1 %v4994_v15 }
 0xc82   :  { %4355 = vmatpush3.bf16.msra.mxu1 %v4564_v1 }
 0xc83   :  { %4356 = vmatprep.subr.bf16.mxu1 %v4994_v15 }
 0xc86   :  { %4357 = vmatpush3.bf16.msra.mxu1 %v4565_v2 }
 0xc87   :  { %4380 = vmatprep.subr.mxu1 %v4994_v15 }
 0xd39   :  { %v1842_v21 = vpop.f32.mrf.mxu1 }
 0xd3a   :  { %v1843_v22 = vadd.f32 %v4076_v20, %v1842_v21  ;;  %v4086_v21 = vld [vmem:[#allocation17] ss:$0 sm:$0xff] }
 0xd3b   :  { %v4340_v23 = vpop.f32.mrf.mxu1 }
 0xd3c   :  { %v1849_v24 = vadd.f32 %v1843_v22, %v5210_v31 }
 0xd3d   :  { %v1845_v25 = vpop.f32.mrf.mxu1 }
 0xd3e   :  { %v1846_v26 = vadd.f32 %v4076_v20, %v1845_v25  ;;  %v1853_v27 = vsel %vm279_vm0, %v1849_v24, 0.0 }
 0xd3f   :  { %1854 = vadd.xlane.f32.xlu0 %v1853_v27  ;;  %v4341_v28 = vpop.f32.mrf.mxu1 }
 0xd40   :  { %v1850_v29 = vadd.f32 %v1846_v26, %v5212_v32  ;;  %v4561_v32 = vld [vmem:[%s5681_s25] sm:$0xff]  }
 0xd41   :  { %4345 = vmatpush3.bf16.msra.mxu0 %v4561_v32  ;;  %v4566_v32 = vld [vmem:[%s5683_s17 + $0x8] sm:$0xff]  }
 0xd42   :  { %v1856_v30 = vsel %vm279_vm0, %v1850_v29, 0.0  ;;  %4362 = vmatprep.subr.bf16.mxu0 %v4994_v15 }
 0xd43   :  { %1857 = vadd.xlane.f32.xlu1 %v1856_v30 }
 0xdc8   :  { %v1855_v33 = vpop.xlane.xlu0 %1854 }
 0xdc9   :  { %v1859_v34 = vmul.f32 0.03125, %v1855_v33 }
 0xdcb   :  { %v1861_v35 = vsub.f32 %v1849_v24, %v1859_v34 }
 0xdcc   :  { %v1858_v37 = vpop.xlane.xlu1 %1857 }
 0xdcd   :  { %v1860_v38 = vmul.f32 0.03125, %v1858_v37  ;;  %v1863_v40 = vmul.f32 %v1861_v35, %v1861_v35 }
 0xdcf   :  { %v1862_v31 = vsub.f32 %v1850_v29, %v1860_v38  ;;  %v1865_v41 = vsel %vm279_vm0, %v1863_v40, 0.0 }
 0xdd0   :  { %1866 = vadd.xlane.f32.xlu0 %v1865_v41 }
 0xdd1   :  { %v1864_v42 = vmul.f32 %v1862_v31, %v1862_v31 }
 0xdd3   :  { %v1868_v43 = vsel %vm279_vm0, %v1864_v42, 0.0 }
 0xdd4   :  { %1869 = vadd.xlane.f32.xlu0 %v1868_v43 }
 0xe59   :  { %v1867_v45 = vpop.xlane.xlu0 %1866 }
 0xe5a   :  { %v1871_v46 = vmul.f32 0.03125, %v1867_v45  ;;  %v4567_v45 = vld [vmem:[%s5683_s17] sm:$0xff]  }
 0xe5c   :  { %v1873_v47 = vadd.f32 1e-12, %v1871_v46 }
 0xe5d   :  { %v1870_v48 = vpop.xlane.xlu0 %1869 }
 0xe5e   :  { %4616 = vrsqrt.f32 %v1873_v47  ;;  %v1872_v49 = vmul.f32 0.03125, %v1870_v48 }
 0xe60   :  { %v1874_v50 = vadd.f32 1e-12, %v1872_v49 }
 0xe62   :  { %4618 = vrsqrt.f32 %v1874_v50 }
 0xe6b   :  { %v4617_v51 = vpop.eup %4616 }
 0xe6c   :  { %v1877_v52 = vmul.f32 %v4617_v51, %v1861_v35 }
 0xe6e   :  { %v1885_v58 = vmul.f32 %v4080_v54, %v1877_v52 }
 0xe6f   :  { %v4619_v55 = vpop.eup %4618 }
 0xe70   :  { %v1878_v56 = vmul.f32 %v4619_v55, %v1862_v31  ;;  %v1893_v60 = vadd.f32 %v4081_v39, %v1885_v58  ;;  %v4092_v55 = vld [vmem:[#allocation18] ss:$0 sm:$0xff] }
 0xe72   :  { %v1886_v59 = vmul.f32 %v4080_v54, %v1878_v56 }
 0xe74   :  { %v1894_v61 = vadd.f32 %v4081_v39, %v1886_v59  ;;  %v4093_v59 = vld [vmem:[#allocation20] ss:$0 sm:$0xff] }
 0xe76   :  { %v1895_v62 = vpack.c.bf16 %v1894_v61, %v1893_v60 }
 0xe78   :  { %4347 = vmatmul.mubr.msk.bf16.vlgmr.msra.gmra.mxu0 %vm279_vm0, %v1895_v62 }
 0xe79   :  { %4366 = vmatprep.mubr.msk.bf16.mxu0 %vm4995_vm1, %v4994_v15  ;;  %4363 = vmatpush3.bf16.msra.mxu0 %v4566_v32 }
 0xe7a   :  { %4364 = vmatprep.subr.bf16.mxu0 %v4994_v15 }
 0xe7d   :  { %4365 = vmatpush3.bf16.msra.mxu0 %v4567_v45 }
 0xe7e   :  { %4370 = vmatprep.subr.mxu0 %v4994_v15 }
 0xf38   :  { %v1956_v4 = vpop.f32.mrf.mxu0 }
 0xf39   :  { %v1957_v5 = vadd.f32 %v4082_v3, %v1956_v4 }
 0xf3a   :  { %v4348_v6 = vpop.f32.mrf.mxu0 }
 0xf3b   :  { %v1965_v36 = vmul.f32 0.70710677, %v1957_v5  ;;  %v1963_v14 = vmul.f32 0.5, %v1957_v5 }
 0xf3c   :  { %v1959_v7 = vpop.f32.mrf.mxu0 }
 0xf3d   :  { %4620 = verf.f32 %v1965_v36  ;;  %v1960_v8 = vadd.f32 %v4082_v3, %v1959_v7 }
 0xf3e   :  { %v4349_v9 = vpop.f32.mrf.mxu0 }
 0xf3f   :  { %v1966_v10 = vmul.f32 0.70710677, %v1960_v8  ;;  %v1964_v16 = vmul.f32 0.5, %v1960_v8 }
 0xf41   :  { %4622 = verf.f32 %v1966_v10 }
 0xf4a   :  { %v4621_v11 = vpop.eup %4620 }
 0xf4b   :  { %v1969_v12 = vadd.f32 1.0, %v4621_v11 }
 0xf4d   :  { %v1971_v18 = vmul.f32 %v1969_v12, %v1963_v14 }
 0xf4e   :  { %v4623_v13 = vpop.eup %4622 }
 0xf4f   :  { %v1970_v17 = vadd.f32 1.0, %v4623_v13 }
 0xf51   :  { %v1972_v19 = vmul.f32 %v1970_v17, %v1964_v16 }
 0xf53   :  { %v1973_v20 = vpack.c.bf16 %v1972_v19, %v1971_v18 }
 0xf55   :  { %4359 = vmatmul.mubr.msk.bf16.vlgmr.msra.gmra.mxu1 %vm2013_vm6, %v1973_v20 }
 0xf56   :  { %4382 = vmatprep.mubr.msk.f32.mxu1 %vm4995_vm1, %v4994_v15 }
0x1015   :  { %v2051_v22 = vpop.f32.mrf.mxu1 }
0x1016   :  { %v2052_v23 = vadd.f32 %v4086_v21, %v2051_v22 }
0x1017   :  { %v4360_v24 = vpop.f32.mrf.mxu1 }
0x1018   :  { %v2058_v25 = vadd.f32 %v2052_v23, %v1893_v60 }
0x1019   :  { %v2054_v26 = vpop.f32.mrf.mxu1 }
0x101a   :  { %v2055_v27 = vadd.f32 %v4086_v21, %v2054_v26  ;;  %v2062_v28 = vsel %vm279_vm0, %v2058_v25, 0.0 }
0x101b   :  { %2063 = vadd.xlane.f32.xlu0 %v2062_v28  ;;  %v4361_v29 = vpop.f32.mrf.mxu1 }
0x101c   :  { %v2059_v30 = vadd.f32 %v2055_v27, %v1894_v61 }
0x101e   :  { %v2065_v33 = vsel %vm279_vm0, %v2059_v30, 0.0 }
0x101f   :  { %2066 = vadd.xlane.f32.xlu1 %v2065_v33 }
0x10a4   :  { %v2064_v34 = vpop.xlane.xlu0 %2063 }
0x10a5   :  { %v2068_v35 = vmul.f32 0.03125, %v2064_v34 }
0x10a7   :  { %v2070_v37 = vsub.f32 %v2058_v25, %v2068_v35 }
0x10a8   :  { %v2067_v38 = vpop.xlane.xlu1 %2066 }
0x10a9   :  { %v2069_v40 = vmul.f32 0.03125, %v2067_v38  ;;  %v2072_v31 = vmul.f32 %v2070_v37, %v2070_v37 }
0x10ab   :  { %v2071_v41 = vsub.f32 %v2059_v30, %v2069_v40  ;;  %v2074_v42 = vsel %vm279_vm0, %v2072_v31, 0.0 }
0x10ac   :  { %2075 = vadd.xlane.f32.xlu0 %v2074_v42 }
0x10ad   :  { %v2073_v43 = vmul.f32 %v2071_v41, %v2071_v41 }
0x10af   :  { %v2077_v44 = vsel %vm279_vm0, %v2073_v43, 0.0 }
0x10b0   :  { %2078 = vadd.xlane.f32.xlu1 %v2077_v44 }
0x1135   :  { %v2076_v46 = vpop.xlane.xlu0 %2075 }
0x1136   :  { %v2080_v47 = vmul.f32 0.03125, %v2076_v46 }
0x1138   :  { %v2082_v48 = vadd.f32 1e-12, %v2080_v47 }
0x1139   :  { %v2079_v49 = vpop.xlane.xlu1 %2078 }
0x113a   :  { %4624 = vrsqrt.f32 %v2082_v48  ;;  %v2081_v50 = vmul.f32 0.03125, %v2079_v49 }
0x113c   :  { %v2083_v51 = vadd.f32 1e-12, %v2081_v50 }
0x113e   :  { %4626 = vrsqrt.f32 %v2083_v51 }
0x1147   :  { %v4625_v52 = vpop.eup %4624 }
0x1148   :  { %v2086_v54 = vmul.f32 %v4625_v52, %v2070_v37 }
0x114a   :  { %v2094_v39 = vmul.f32 %v4092_v55, %v2086_v54 }
0x114b   :  { %v4627_v56 = vpop.eup %4626 }
0x114c   :  { %v2087_v58 = vmul.f32 %v4627_v56, %v2071_v41  ;;  %v5428_v61 = vadd.f32 %v4093_v59, %v2094_v39 }
0x114e   :  { %v2095_v60 = vmul.f32 %v4092_v55, %v2087_v58 }
0x1150   :  { %v5430_v62 = vadd.f32 %v4093_v59, %v2095_v60 }
0x1152   :  { %v2104_v63 = vpack.c.bf16 %v5430_v62, %v5428_v61 }
0x1154   :  { %4367 = vmatmul.mubr.msk.bf16.vlgmr.msra.gmra.mxu0 %vm279_vm0, %v2104_v63 }
0x1155   :  { %4372 = vmatprep.mubr.msk.f32.mxu0 %vm4995_vm1, %v4994_v15 }
0x1214   :  { %v2165_v1 = vpop.f32.mrf.mxu0 }
0x1215   :  { %v5437_v2 = vadd.f32 %v4094_v0, %v2165_v1 }
0x1216   :  { %v4368_v3 = vpop.f32.mrf.mxu0 }
0x1217   :  { %2173 = vrot.lane.b32.xlu0 %v5437_v2, %s4996_s5 }
0x1218   :  { %v2168_v4 = vpop.f32.mrf.mxu0 }
0x1219   :  { %v5441_v5 = vadd.f32 %v4094_v0, %v2168_v4 }
0x121a   :  { %v4369_v6 = vpop.f32.mrf.mxu0 }
0x121b   :  { %2250 = vrot.lane.b32.xlu1 %v5441_v5, %s4996_s5  ;;  %s5693_s5 = sld [smem:[#allocation44_spill]] }
0x1289   :  { %v2174_v36 = vpop.permute.xlu0 %2173 }
0x128a   :  { %4371 = vmatpush3.xpose.msk.msra.mxu0 %vm428_vm2, %v2174_v36 }
0x128b   :  { %4375 = vmatprep.subr.mxu0 %v4994_v15 }
0x128d   :  { %4373 = vmatmul.mubr.msk.f32.vlgmr.msra.gmra.mxu0 %vm428_vm2, %v5437_v2  ;;  %v2251_v7 = vpop.permute.xlu1 %2250 }
0x128e   :  { %4376 = vmatpush3.xpose.msk.msra.mxu0 %vm428_vm2, %v2251_v7  ;;  %4377 = vmatprep.mubr.msk.f32.mxu0 %vm4995_vm1, %v4994_v15 }
0x128f   :  { %4385 = vmatprep.subr.mxu0 %v4994_v15 }
0x1291   :  { %4378 = vmatmul.mubr.msk.f32.vlgmr.msra.gmra.mxu0 %vm428_vm2, %v5441_v5 }
0x1292   :  { %4387 = vmatprep.mubr.msk.f32.mxu0 %vm4995_vm1, %v4994_v15 }
0x134d   :  { %v2245_v8 = vpop.f32.mrf.mxu0 }
0x134e   :  { %v2246_v9 = vadd.f32 %v2245_v8, %v5239_v53 }
0x134f   :  { %v4374_v10 = vpop.f32.mrf.mxu0 }
0x1350   :  { %v2326_v11 = vsel %vm428_vm2, %v2246_v9, -inf }
0x1351   :  { %2327 = vmax.xlane.f32.xlu1 %v2326_v11  ;;  %v2322_v12 = vpop.f32.mrf.mxu0 }
0x1352   :  { %v2323_v13 = vadd.f32 %v2322_v12, %v5242_v57 }
0x1353   :  { %v4379_v14 = vpop.f32.mrf.mxu0 }
0x1354   :  { %v2329_v16 = vsel %vm428_vm2, %v2323_v13, -inf }
0x1355   :  { %2330 = vmax.xlane.f32.xlu0 %v2329_v16 }
0x1362   :  { %2424 = vrot.lane.b32.xlu1 %v5441_v5, %s4998_s21 }
0x1366   :  { %2504 = vrot.lane.b32.xlu1 %v5437_v2, %s4999_s6 }
0x136a   :  { %2582 = vrot.lane.b32.xlu1 %v5441_v5, %s4999_s6  ;;  %s5011_s6 = smov [#allocation23]  }
0x13da   :  { %v2328_v17 = vpop.xlane.xlu1 %2327 }
0x13db   :  { %v2332_v18 = vsub.f32 %v2246_v9, %v2328_v17 }
0x13dd   :  { %v2334_v19 = vmul.f32 1.442695, %v2332_v18 }
0x13de   :  { %v2425_v20 = vpop.permute.xlu1 %2424  ;;  %v2331_v21 = vpop.xlane.xlu0 %2330 }
0x13df   :  { %4628 = vpow2.f32 %v2334_v19  ;;  %v2333_v22 = vsub.f32 %v2323_v13, %v2331_v21  ;;  %4386 = vmatpush3.msra.mxu0 %v2425_v20 }
0x13e0   :  { %4395 = vmatprep.subr.mxu0 %v4994_v15 }
0x13e1   :  { %v2336_v23 = vmul.f32 1.442695, %v2333_v22 }
0x13e2   :  { %v2505_v28 = vpop.permute.xlu1 %2504 }
0x13e3   :  { %4630 = vpow2.f32 %v2336_v23 }
0x13e6   :  { %v2583_v29 = vpop.permute.xlu1 %2582 }
0x13ec   :  { %v4629_v24 = vpop.eup %4628 }
0x13ed   :  { %v2338_v25 = vsel %vm428_vm2, %v4629_v24, 0.0 }
0x13ee   :  { %2339 = vadd.xlane.f32.xlu0 %v2338_v25 }
0x13f0   :  { %v4631_v26 = vpop.eup %4630 }
0x13f1   :  { %v2341_v27 = vsel %vm428_vm2, %v4631_v26, 0.0 }
0x13f2   :  { %2342 = vadd.xlane.f32.xlu1 %v2341_v27 }
0x1403   :  { %2580 = vrot.lane.b32.xlu1 %v5441_v5, %s5000_s20 }
0x1404   :  { %2348 = vrot.lane.b32.xlu0 %v5437_v2, %s4998_s21  ;;  %s5694_s21 = sld [smem:[#allocation45_spill]] }
0x1408   :  { %2502 = vrot.lane.b32.xlu0 %v5437_v2, %s5000_s20  ;;  %s3998_s20 = sshll.u32 %s5011_s6, 4  ;;  %s3999_s20 = int_to_ptr.vmem [resolvable:$true] %s3998_s20 }
0x1409   :  { %p4919_p5 = scmp.lt.s32.totalorder %s3999_s20, %s3999_s20 }
0x1477   :  { %v2340_v30 = vpop.xlane.xlu0 %2339 }
0x1478   :  { %4632 = vrcp.f32 %v2340_v30 }
0x147b   :  { %v2343_v33 = vpop.xlane.xlu1 %2342  ;;  %v2349_v34 = vpop.permute.xlu0 %2348 }
0x147c   :  { %4634 = vrcp.f32 %v2343_v33  ;;  %4381 = vmatpush3.msra.mxu1 %v2349_v34 }
0x147d   :  { %4390 = vmatprep.subr.mxu1 %v4994_v15 }
0x147f   :  { %v2503_v31 = vpop.permute.xlu0 %2502  ;;  %v2581_v41 = vpop.permute.xlu1 %2580 }
0x1485   :  { %v4633_v35 = vpop.eup %4632 }
0x1486   :  { %v2346_v37 = vmul.f32 %v4633_v35, %v4629_v24 }
0x1488   :  { %4383 = vmatmul.mubr.msk.f32.vlgmr.msra.gmra.mxu1 %vm428_vm2, %v2346_v37 }
0x1489   :  { %v4635_v38 = vpop.eup %4634  ;;  %4391 = vmatpush3.xpose.msk.msra.mxu1 %vm428_vm2, %v2505_v28  ;;  %4392 = vmatprep.mubr.msk.f32.mxu1 %vm4995_vm1, %v4994_v15 }
0x148a   :  { %v2347_v40 = vmul.f32 %v4635_v38, %v4631_v26  ;;  %4400 = vmatprep.subr.mxu1 %v4994_v15 }
0x148c   :  { %4388 = vmatmul.mubr.msk.f32.vlgmr.msra.gmra.mxu0 %vm428_vm2, %v2347_v40  ;;  %4393 = vmatmul.mubr.msk.f32.vlgmr.msra.gmra.mxu1 %vm428_vm2, %v2503_v31 }
0x148d   :  { %4396 = vmatpush3.xpose.msk.msra.mxu0 %vm428_vm2, %v2583_v29  ;;  %4397 = vmatprep.mubr.msk.f32.mxu0 %vm4995_vm1, %v4994_v15 }
0x148e   :  { %4405 = vmatprep.subr.mxu0 %v4994_v15  ;;  %4402 = vmatprep.mubr.msk.f32.mxu1 %vm4995_vm1, %v4994_v15 }
0x1490   :  { %4398 = vmatmul.mubr.msk.f32.vlgmr.msra.gmra.mxu0 %vm428_vm2, %v2581_v41 }
0x1491   :  { %4407 = vmatprep.mubr.msk.f32.mxu0 %vm4995_vm1, %v4994_v15 }
0x1548   :  { %v2420_v42 = vpop.f32.mrf.mxu1 }
0x1549   :  { %2500 = vst.msk [vmem:[#allocation2] sm:$0xff] %vm428_vm2, %v2420_v42 }
0x154a   :  { %v4384_v43 = vpop.f32.mrf.mxu1 }
0x154c   :  { %v2496_v44 = vpop.f32.mrf.mxu0  ;;  %v2576_v32 = vpop.f32.mrf.mxu1 }
0x154d   :  { %2501 = vst.msk [vmem:[#allocation2 + $0x8] sm:$0xff] %vm428_vm2, %v2496_v44  ;;  %v2577_v45 = vadd.f32 %v2576_v32, %v5239_v53 }
0x154e   :  { %v4389_v46 = vpop.f32.mrf.mxu0  ;;  %v4394_v47 = vpop.f32.mrf.mxu1 }
0x154f   :  { %v2658_v48 = vsel %vm428_vm2, %v2577_v45, -inf }
0x1550   :  { %2659 = vmax.xlane.f32.xlu0 %v2658_v48  ;;  %v2654_v49 = vpop.f32.mrf.mxu0 }
0x1551   :  { %v2655_v50 = vadd.f32 %v2654_v49, %v5242_v57 }
0x1552   :  { %v4399_v51 = vpop.f32.mrf.mxu0 }
0x1553   :  { %v2661_v52 = vsel %vm428_vm2, %v2655_v50, -inf }
0x1554   :  { %2662 = vmax.xlane.f32.xlu1 %v2661_v52 }
0x1565   :  { %2756 = vrot.lane.b32.xlu1 %v5441_v5, %s5001_s4 }
0x1569   :  { %2844 = vrot.lane.b32.xlu1 %v5437_v2, %s5002_s16 }
0x156d   :  { %2922 = vrot.lane.b32.xlu1 %v5441_v5, %s5002_s16 }
0x1571   :  { %2920 = vrot.lane.b32.xlu1 %v5441_v5, %s5003_s18 }
0x15d9   :  { %v2660_v54 = vpop.xlane.xlu0 %2659 }
0x15da   :  { %v2664_v55 = vsub.f32 %v2577_v45, %v2660_v54 }
0x15dc   :  { %v2666_v56 = vmul.f32 1.442695, %v2664_v55 }
0x15dd   :  { %v2663_v58 = vpop.xlane.xlu1 %2662 }
0x15de   :  { %4636 = vpow2.f32 %v2666_v56  ;;  %v2665_v39 = vsub.f32 %v2655_v50, %v2663_v58 }
0x15e0   :  { %v2668_v59 = vmul.f32 1.442695, %v2665_v39 }
0x15e1   :  { %v2757_v60 = vpop.permute.xlu1 %2756 }
0x15e2   :  { %4638 = vpow2.f32 %v2668_v59  ;;  %4406 = vmatpush3.msra.mxu0 %v2757_v60 }
0x15e3   :  { %4415 = vmatprep.subr.mxu0 %v4994_v15 }
0x15e5   :  { %v2845_v7 = vpop.permute.xlu1 %2844 }
0x15e9   :  { %v2923_v11 = vpop.permute.xlu1 %2922 }
0x15eb   :  { %v4637_v63 = vpop.eup %4636 }
0x15ec   :  { %v2670_v0 = vsel %vm428_vm2, %v4637_v63, 0.0 }
0x15ed   :  { %2671 = vadd.xlane.f32.xlu0 %v2670_v0  ;;  %v2921_v14 = vpop.permute.xlu1 %2920 }
0x15ef   :  { %v4639_v1 = vpop.eup %4638 }
0x15f0   :  { %v2673_v3 = vsel %vm428_vm2, %v4639_v1, 0.0 }
0x15f1   :  { %2674 = vadd.xlane.f32.xlu0 %v2673_v3 }
0x1607   :  { %2680 = vrot.lane.b32.xlu0 %v5437_v2, %s5001_s4 }
0x160b   :  { %2842 = vrot.lane.b32.xlu0 %v5437_v2, %s5003_s18 }
0x1676   :  { %v2672_v4 = vpop.xlane.xlu0 %2671 }
0x1677   :  { %4640 = vrcp.f32 %v2672_v4 }
0x167a   :  { %v2675_v6 = vpop.xlane.xlu0 %2674 }
0x167b   :  { %4642 = vrcp.f32 %v2675_v6 }
0x167e   :  { %v2681_v36 = vpop.permute.xlu0 %2680 }
0x167f   :  { %4401 = vmatpush3.msra.mxu1 %v2681_v36 }
0x1680   :  { %4410 = vmatprep.subr.mxu1 %v4994_v15 }
0x1682   :  { %v2843_v13 = vpop.permute.xlu0 %2842 }
0x1684   :  { %v4641_v8 = vpop.eup %4640 }
0x1685   :  { %v2678_v9 = vmul.f32 %v4641_v8, %v4637_v63 }
0x1687   :  { %4403 = vmatmul.mubr.msk.f32.vlgmr.msra.gmra.mxu1 %vm428_vm2, %v2678_v9 }
0x1688   :  { %v4643_v10 = vpop.eup %4642  ;;  %4411 = vmatpush3.xpose.msk.msra.mxu1 %vm428_vm2, %v2845_v7  ;;  %4412 = vmatprep.mubr.msk.f32.mxu1 %vm4995_vm1, %v4994_v15 }
0x1689   :  { %v2679_v12 = vmul.f32 %v4643_v10, %v4639_v1  ;;  %4420 = vmatprep.subr.mxu1 %v4994_v15 }
0x168b   :  { %4408 = vmatmul.mubr.msk.f32.vlgmr.msra.gmra.mxu0 %vm428_vm2, %v2679_v12  ;;  %4413 = vmatmul.mubr.msk.f32.vlgmr.msra.gmra.mxu1 %vm428_vm2, %v2843_v13 }
0x168c   :  { %4416 = vmatpush3.xpose.msk.msra.mxu0 %vm428_vm2, %v2923_v11  ;;  %4417 = vmatprep.mubr.msk.f32.mxu0 %vm4995_vm1, %v4994_v15 }
0x168d   :  { %4425 = vmatprep.subr.mxu0 %v4994_v15  ;;  %4422 = vmatprep.mubr.msk.f32.mxu1 %vm4995_vm1, %v4994_v15 }
0x168f   :  { %4418 = vmatmul.mubr.msk.f32.vlgmr.msra.gmra.mxu0 %vm428_vm2, %v2921_v14 }
0x1690   :  { %4427 = vmatprep.mubr.msk.f32.mxu0 %vm4995_vm1, %v4994_v15 }
0x1747   :  { %v5531_v16 = vpop.f32.mrf.mxu1 }
0x1749   :  { %v4404_v17 = vpop.f32.mrf.mxu1 }
0x174b   :  { %v5533_v18 = vpop.f32.mrf.mxu0  ;;  %v2916_v19 = vpop.f32.mrf.mxu1 }
0x174c   :  { %v2917_v20 = vadd.f32 %v2916_v19, %v5239_v53 }
0x174d   :  { %v4409_v21 = vpop.f32.mrf.mxu0  ;;  %v4414_v22 = vpop.f32.mrf.mxu1 }
0x174e   :  { %v2998_v23 = vsel %vm428_vm2, %v2917_v20, -inf }
0x174f   :  { %2999 = vmax.xlane.f32.xlu0 %v2998_v23  ;;  %v2994_v24 = vpop.f32.mrf.mxu0  ;;  %v4568_v23 = vld [vmem:[%s5684_s7 + $0x8] sm:$0xff]  }
0x1750   :  { %v2995_v25 = vadd.f32 %v2994_v24, %v5242_v57  ;;  %v4569_v24 = vld [vmem:[%s5684_s7] sm:$0xff]  }
0x1751   :  { %v4419_v26 = vpop.f32.mrf.mxu0 }
0x1752   :  { %v3001_v27 = vsel %vm428_vm2, %v2995_v25, -inf }
0x1753   :  { %3002 = vmax.xlane.f32.xlu1 %v3001_v27 }
0x1764   :  { %3096 = vrot.lane.b32.xlu1 %v5441_v5, %s5004_s22 }
0x1768   :  { %3184 = vrot.lane.b32.xlu1 %v5437_v2, %s5005_s23 }
0x176c   :  { %3262 = vrot.lane.b32.xlu1 %v5441_v5, %s5005_s23 }
0x1770   :  { %3260 = vrot.lane.b32.xlu1 %v5441_v5, %s5006_s12 }
0x17d8   :  { %v3000_v28 = vpop.xlane.xlu0 %2999 }
0x17d9   :  { %v3004_v29 = vsub.f32 %v2917_v20, %v3000_v28 }
0x17db   :  { %v3006_v30 = vmul.f32 1.442695, %v3004_v29 }
0x17dc   :  { %v3003_v33 = vpop.xlane.xlu1 %3002 }
0x17dd   :  { %4644 = vpow2.f32 %v3006_v30  ;;  %v3005_v34 = vsub.f32 %v2995_v25, %v3003_v33 }
0x17df   :  { %v3008_v35 = vmul.f32 1.442695, %v3005_v34 }
0x17e0   :  { %v3097_v37 = vpop.permute.xlu1 %3096 }
0x17e1   :  { %4646 = vpow2.f32 %v3008_v35  ;;  %4426 = vmatpush3.msra.mxu0 %v3097_v37  ;;  %v4122_v37 = vld [vmem:[%s5685_s3] ss:$0 sm:$0xff] }
0x17e2   :  { %4435 = vmatprep.subr.mxu0 %v4994_v15 }
0x17e4   :  { %v3185_v32 = vpop.permute.xlu1 %3184 }
0x17e8   :  { %v3263_v48 = vpop.permute.xlu1 %3262 }
0x17ea   :  { %v4645_v38 = vpop.eup %4644 }
0x17eb   :  { %v3010_v40 = vsel %vm428_vm2, %v4645_v38, 0.0 }
0x17ec   :  { %3011 = vadd.xlane.f32.xlu0 %v3010_v40  ;;  %v3261_v51 = vpop.permute.xlu1 %3260 }
0x17ee   :  { %v4647_v31 = vpop.eup %4646 }
0x17ef   :  { %v3013_v41 = vsel %vm428_vm2, %v4647_v31, 0.0 }
0x17f0   :  { %3014 = vadd.xlane.f32.xlu0 %v3013_v41 }
0x1806   :  { %3020 = vrot.lane.b32.xlu0 %v5437_v2, %s5004_s22 }
0x180a   :  { %3182 = vrot.lane.b32.xlu0 %v5437_v2, %s5006_s12 }
0x1875   :  { %v3012_v42 = vpop.xlane.xlu0 %3011 }
0x1876   :  { %4648 = vrcp.f32 %v3012_v42 }
0x1879   :  { %v3015_v43 = vpop.xlane.xlu0 %3014 }
0x187a   :  { %4650 = vrcp.f32 %v3015_v43 }
0x187d   :  { %v3021_v44 = vpop.permute.xlu0 %3020 }
0x187e   :  { %4421 = vmatpush3.msra.mxu1 %v3021_v44 }
0x187f   :  { %4430 = vmatprep.subr.mxu1 %v4994_v15 }
0x1881   :  { %v3183_v50 = vpop.permute.xlu0 %3182 }
0x1883   :  { %v4649_v45 = vpop.eup %4648 }
0x1884   :  { %v3018_v46 = vmul.f32 %v4649_v45, %v4645_v38 }
0x1886   :  { %4423 = vmatmul.mubr.msk.f32.vlgmr.msra.gmra.mxu1 %vm428_vm2, %v3018_v46 }
0x1887   :  { %v4651_v47 = vpop.eup %4650  ;;  %4431 = vmatpush3.xpose.msk.msra.mxu1 %vm428_vm2, %v3185_v32  ;;  %4432 = vmatprep.mubr.msk.f32.mxu1 %vm4995_vm1, %v4994_v15 }
0x1888   :  { %v3019_v49 = vmul.f32 %v4651_v47, %v4647_v31  ;;  %4440 = vmatprep.subr.mxu1 %v4994_v15 }
0x188a   :  { %4428 = vmatmul.mubr.msk.f32.vlgmr.msra.gmra.mxu0 %vm428_vm2, %v3019_v49  ;;  %4433 = vmatmul.mubr.msk.f32.vlgmr.msra.gmra.mxu1 %vm428_vm2, %v3183_v50 }
0x188b   :  { %4436 = vmatpush3.xpose.msk.msra.mxu0 %vm428_vm2, %v3263_v48  ;;  %4437 = vmatprep.mubr.msk.f32.mxu0 %vm4995_vm1, %v4994_v15 }
0x188c   :  { %4445 = vmatprep.subr.mxu0 %v4994_v15  ;;  %4442 = vmatprep.mubr.msk.f32.mxu1 %vm4995_vm1, %v4994_v15 }
0x188e   :  { %4438 = vmatmul.mubr.msk.f32.vlgmr.msra.gmra.mxu0 %vm428_vm2, %v3261_v51 }
0x188f   :  { %4447 = vmatprep.mubr.msk.f32.mxu0 %vm4995_vm1, %v4994_v15 }
0x1946   :  { %v3092_v52 = vpop.f32.mrf.mxu1 }
0x1948   :  { %v4424_v54 = vpop.f32.mrf.mxu1 }
0x194a   :  { %v3168_v55 = vpop.f32.mrf.mxu0  ;;  %v3256_v56 = vpop.f32.mrf.mxu1 }
0x194b   :  { %v3257_v58 = vadd.f32 %v3256_v56, %v5239_v53 }
0x194c   :  { %v4429_v39 = vpop.f32.mrf.mxu0  ;;  %v4434_v59 = vpop.f32.mrf.mxu1 }
0x194d   :  { %v3338_v60 = vsel %vm428_vm2, %v3257_v58, -inf }
0x194e   :  { %3339 = vmax.xlane.f32.xlu0 %v3338_v60  ;;  %v3334_v63 = vpop.f32.mrf.mxu0 }
0x194f   :  { %v3335_v0 = vadd.f32 %v3334_v63, %v5242_v57 }
0x1950   :  { %v4439_v1 = vpop.f32.mrf.mxu0 }
0x1951   :  { %v3341_v3 = vsel %vm428_vm2, %v3335_v0, -inf }
0x1952   :  { %3342 = vmax.xlane.f32.xlu1 %v3341_v3 }
0x1963   :  { %3436 = vrot.lane.b32.xlu1 %v5441_v5, %s5007_s26 }
0x1967   :  { %2834 = vrot.lane.b32.xlu1 %v5531_v16, %s5008_s9 }
0x196b   :  { %2836 = vrot.lane.b32.xlu1 %v5533_v18, %s5008_s9 }
0x196f   :  { %3176 = vrot.lane.b32.xlu1 %v3168_v55, %s5009_s28 }
0x19d7   :  { %v3340_v53 = vpop.xlane.xlu0 %3339 }
0x19d8   :  { %v3344_v4 = vsub.f32 %v3257_v58, %v3340_v53  ;;  %v4570_v58 = vld [vmem:[%s5686_s10 + $0x8] sm:$0xff]  }
0x19da   :  { %v3346_v6 = vmul.f32 1.442695, %v3344_v4  ;;  %v4126_v4 = vld [vmem:[%s5687_s11] ss:$0 sm:$0xff] }
0x19db   :  { %v3343_v36 = vpop.xlane.xlu1 %3342 }
0x19dc   :  { %4652 = vpow2.f32 %v3346_v6  ;;  %v3345_v57 = vsub.f32 %v3335_v0, %v3343_v36 }
0x19de   :  { %v3348_v7 = vmul.f32 1.442695, %v3345_v57 }
0x19df   :  { %v3437_v8 = vpop.permute.xlu1 %3436 }
0x19e0   :  { %4654 = vpow2.f32 %v3348_v7  ;;  %4446 = vmatpush3.msra.mxu0 %v3437_v8  ;;  %v4127_v7 = vld [vmem:[%s5688_s0] ss:$0 sm:$0xff] }
0x19e1   :  { %4458 = vmatprep.subr.bf16.mxu0 %v4994_v15 }
0x19e3   :  { %v2835_v5 = vpop.permute.xlu1 %2834 }
0x19e4   :  { %2840 = vst.msk [vmem:[#allocation2] sm:$0xff] %vm1094_vm3, %v2835_v5 }
0x19e7   :  { %v2837_v9 = vpop.permute.xlu1 %2836 }
0x19e8   :  { %2841 = vst.msk [vmem:[#allocation2 + $0x8] sm:$0xff] %vm1094_vm3, %v2837_v9 }
0x19e9   :  { %v4653_v10 = vpop.eup %4652 }
0x19ea   :  { %v3350_v11 = vsel %vm428_vm2, %v4653_v10, 0.0 }
0x19eb   :  { %3351 = vadd.xlane.f32.xlu0 %v3350_v11  ;;  %v3177_v12 = vpop.permute.xlu1 %3176  ;;  %v4572_v11 = vld [vmem:[%s5689_s8 + $0x18] sm:$0xff]  }
0x19ec   :  { %3181 = vst.msk [vmem:[#allocation2 + $0x8] sm:$0xff] %vm1435_vm4, %v3177_v12  ;;  %v4573_v12 = vld [vmem:[%s5689_s8 + $0x10] sm:$0xff]  }
0x19ed   :  { %v4655_v13 = vpop.eup %4654 }
0x19ee   :  { %v3353_v14 = vsel %vm428_vm2, %v4655_v13, 0.0 }
0x19ef   :  { %3354 = vadd.xlane.f32.xlu0 %v3353_v14  ;;  %v4575_v14 = vld [vmem:[%s5689_s8] sm:$0xff]  }
0x1a05   :  { %3360 = vrot.lane.b32.xlu0 %v5437_v2, %s5007_s26 }
0x1a09   :  { %3174 = vrot.lane.b32.xlu0 %v3092_v52, %s5009_s28 }
0x1a74   :  { %v3352_v16 = vpop.xlane.xlu0 %3351 }
0x1a75   :  { %4656 = vrcp.f32 %v3352_v16  ;;  %v4128_v16 = vld [vmem:[%s5690_s24] ss:$0 sm:$0xff] }
0x1a78   :  { %v3355_v17 = vpop.xlane.xlu0 %3354 }
0x1a79   :  { %4658 = vrcp.f32 %v3355_v17 }
0x1a7c   :  { %v3361_v18 = vpop.permute.xlu0 %3360 }
0x1a7d   :  { %4441 = vmatpush3.msra.mxu1 %v3361_v18 }
0x1a7e   :  { %4450 = vmatprep.subr.bf16.mxu1 %v4994_v15 }
0x1a80   :  { %v3175_v19 = vpop.permute.xlu0 %3174 }
0x1a81   :  { %3180 = vst.msk [vmem:[#allocation2] sm:$0xff] %vm1435_vm4, %v3175_v19 }
0x1a82   :  { %v4657_v20 = vpop.eup %4656 }
0x1a83   :  { %v3358_v21 = vmul.f32 %v4657_v20, %v4653_v10 }
0x1a85   :  { %4443 = vmatmul.mubr.msk.f32.vlgmr.msra.gmra.mxu1 %vm428_vm2, %v3358_v21 }
0x1a86   :  { %v4659_v2 = vpop.eup %4658  ;;  %4454 = vmatprep.mubr.msk.bf16.mxu1 %vm4995_vm1, %v4994_v15  ;;  %4451 = vmatpush3.bf16.msra.mxu1 %v4568_v23 }
0x1a87   :  { %v3359_v22 = vmul.f32 %v4659_v2, %v4655_v13  ;;  %4452 = vmatprep.subr.bf16.mxu1 %v4994_v15  ;;  %v4574_v13 = vld [vmem:[%s5689_s8 + $0x8] sm:$0xff]  }
0x1a89   :  { %4448 = vmatmul.mubr.msk.f32.vlgmr.msra.gmra.mxu0 %vm428_vm2, %v3359_v22 }
0x1a8a   :  { %4462 = vmatprep.mubr.msk.bf16.mxu0 %vm4995_vm1, %v4994_v15  ;;  %4453 = vmatpush3.bf16.msra.mxu1 %v4569_v24 }
0x1a8b   :  { %4466 = vmatprep.subr.bf16.mxu1 %v4994_v15  ;;  %4459 = vmatpush3.bf16.msra.mxu0 %v4570_v58  ;;  %v4577_v58 = vld [vmem:[%s5692_s15] sm:$0xff]  }
0x1a8c   :  { %4460 = vmatprep.subr.bf16.mxu0 %v4994_v15 }
0x1b45   :  { %v3432_v25 = vpop.f32.mrf.mxu1 }
0x1b46   :  { %3514 = vrot.lane.b32.xlu0 %v3432_v25, %s5010_s1 }
0x1b47   :  { %v4444_v26 = vpop.f32.mrf.mxu1 }
0x1b49   :  { %v3508_v27 = vpop.f32.mrf.mxu0 }
0x1b4a   :  { %3516 = vrot.lane.b32.xlu1 %v3508_v27, %s5010_s1 }
0x1b4b   :  { %v4449_v28 = vpop.f32.mrf.mxu0 }
0x1bb8   :  { %v3515_v29 = vpop.permute.xlu0 %3514 }
0x1bb9   :  { %3520 = vst.msk [vmem:[#allocation2] sm:$0xff] %vm1776_vm5, %v3515_v29 }
0x1bbc   :  { %v3517_v30 = vpop.permute.xlu1 %3516 }
0x1bbd   :  { %3521 = vst.msk [vmem:[#allocation2 + $0x8] sm:$0xff] %vm1776_vm5, %v3517_v30 }
0x1bc0   :  { %v3522_v33 = vld [vmem:[#allocation2] sm:$0xff] }
0x1bc4   :  { %v3523_v34 = vld [vmem:[#allocation2 + $0x8] sm:$0xff] }
0x1bc5   :  { %v3524_v35 = vpack.c.bf16 %v3523_v34, %v3522_v33 }
0x1bc7   :  { %4455 = vmatmul.mubr.msk.bf16.vlgmr.msra.gmra.mxu1 %vm279_vm0, %v3524_v35  ;;  %v4132_v35 = vld [vmem:[%s5691_s14] ss:$0 sm:$0xff] }
0x1bc8   :  { %4474 = vmatprep.mubr.msk.bf16.mxu1 %vm4995_vm1, %v4994_v15  ;;  %4467 = vmatpush3.bf16.msra.mxu1 %v4572_v11 }
0x1bc9   :  { %4468 = vmatprep.subr.bf16.mxu1 %v4994_v15 }
0x1bcc   :  { %4469 = vmatpush3.bf16.msra.mxu1 %v4573_v12 }
0x1bcd   :  { %4470 = vmatprep.subr.bf16.mxu1 %v4994_v15 }
0x1bd0   :  { %4471 = vmatpush3.bf16.msra.mxu1 %v4574_v13 }
0x1bd1   :  { %4472 = vmatprep.subr.bf16.mxu1 %v4994_v15 }
0x1bd4   :  { %4473 = vmatpush3.bf16.msra.mxu1 %v4575_v14 }
0x1c87   :  { %v3585_v38 = vpop.f32.mrf.mxu1 }
0x1c88   :  { %v3586_v40 = vadd.f32 %v4122_v37, %v3585_v38 }
0x1c89   :  { %v4456_v31 = vpop.f32.mrf.mxu1 }
0x1c8a   :  { %v3592_v41 = vadd.f32 %v3586_v40, %v5428_v61 }
0x1c8b   :  { %v3588_v42 = vpop.f32.mrf.mxu1 }
0x1c8c   :  { %v3589_v43 = vadd.f32 %v4122_v37, %v3588_v42  ;;  %v3596_v44 = vsel %vm279_vm0, %v3592_v41, 0.0 }
0x1c8d   :  { %3597 = vadd.xlane.f32.xlu0 %v3596_v44  ;;  %v4457_v32 = vpop.f32.mrf.mxu1 }
0x1c8e   :  { %v3593_v45 = vadd.f32 %v3589_v43, %v5430_v62  ;;  %v4571_v62 = vld [vmem:[%s5686_s10] sm:$0xff]  }
0x1c8f   :  { %4461 = vmatpush3.bf16.msra.mxu0 %v4571_v62 }
0x1c90   :  { %v3599_v46 = vsel %vm279_vm0, %v3593_v45, 0.0  ;;  %4478 = vmatprep.subr.bf16.mxu0 %v4994_v15 }
0x1c91   :  { %3600 = vadd.xlane.f32.xlu1 %v3599_v46 }
0x1d16   :  { %v3598_v47 = vpop.xlane.xlu0 %3597 }
0x1d17   :  { %v3602_v48 = vmul.f32 0.03125, %v3598_v47 }
0x1d19   :  { %v3604_v49 = vsub.f32 %v3592_v41, %v3602_v48 }
0x1d1a   :  { %v3601_v50 = vpop.xlane.xlu1 %3600 }
0x1d1b   :  { %v3603_v51 = vmul.f32 0.03125, %v3601_v50  ;;  %v3606_v52 = vmul.f32 %v3604_v49, %v3604_v49 }
0x1d1d   :  { %v3605_v61 = vsub.f32 %v3593_v45, %v3603_v51  ;;  %v3608_v54 = vsel %vm279_vm0, %v3606_v52, 0.0 }
0x1d1e   :  { %3609 = vadd.xlane.f32.xlu0 %v3608_v54 }
0x1d1f   :  { %v3607_v55 = vmul.f32 %v3605_v61, %v3605_v61 }
0x1d21   :  { %v3611_v56 = vsel %vm279_vm0, %v3607_v55, 0.0 }
0x1d22   :  { %3612 = vadd.xlane.f32.xlu0 %v3611_v56  ;;  %v4576_v56 = vld [vmem:[%s5692_s15 + $0x8] sm:$0xff]  }
0x1da7   :  { %v3610_v39 = vpop.xlane.xlu0 %3609 }
0x1da8   :  { %v3614_v59 = vmul.f32 0.03125, %v3610_v39 }
0x1daa   :  { %v3616_v60 = vadd.f32 1e-12, %v3614_v59 }
0x1dab   :  { %v3613_v63 = vpop.xlane.xlu0 %3612 }
0x1dac   :  { %4660 = vrsqrt.f32 %v3616_v60  ;;  %v3615_v0 = vmul.f32 0.03125, %v3613_v63 }
0x1dae   :  { %v3617_v1 = vadd.f32 1e-12, %v3615_v0 }
0x1db0   :  { %4662 = vrsqrt.f32 %v3617_v1 }
0x1db9   :  { %v4661_v3 = vpop.eup %4660 }
0x1dba   :  { %v3620_v53 = vmul.f32 %v4661_v3, %v3604_v49  ;;  %v4138_v3 = vld [vmem:[%s5693_s5] ss:$0 sm:$0xff] }
0x1dbc   :  { %v3628_v57 = vmul.f32 %v4126_v4, %v3620_v53 }
0x1dbd   :  { %v4663_v6 = vpop.eup %4662 }
0x1dbe   :  { %v3621_v36 = vmul.f32 %v4663_v6, %v3605_v61  ;;  %v3636_v5 = vadd.f32 %v4127_v7, %v3628_v57 }
0x1dc0   :  { %v3629_v8 = vmul.f32 %v4126_v4, %v3621_v36  ;;  %v4139_v36 = vld [vmem:[%s5694_s21] ss:$0 sm:$0xff] }
0x1dc2   :  { %v3637_v9 = vadd.f32 %v4127_v7, %v3629_v8 }
0x1dc4   :  { %v3638_v10 = vpack.c.bf16 %v3637_v9, %v3636_v5 }
0x1dc6   :  { %4463 = vmatmul.mubr.msk.bf16.vlgmr.msra.gmra.mxu0 %vm279_vm0, %v3638_v10 }
0x1dc7   :  { %4482 = vmatprep.mubr.msk.bf16.mxu0 %vm4995_vm1, %v4994_v15  ;;  %4479 = vmatpush3.bf16.msra.mxu0 %v4576_v56 }
0x1dc8   :  { %4480 = vmatprep.subr.bf16.mxu0 %v4994_v15 }
0x1dcb   :  { %4481 = vmatpush3.bf16.msra.mxu0 %v4577_v58 }
0x1dcc   :  { %4486 = vmatprep.subr.bf16.mxu0 %v4994_v15 }
0x1e86   :  { %v3699_v17 = vpop.f32.mrf.mxu0 }
0x1e87   :  { %v3700_v18 = vadd.f32 %v4128_v16, %v3699_v17  ;;  %v4578_v17 = vld [vmem:[%s5170_s30 + $0x8] sm:$0xff]  }
0x1e88   :  { %v4464_v19 = vpop.f32.mrf.mxu0 }
0x1e89   :  { %v3708_v20 = vmul.f32 0.70710677, %v3700_v18  ;;  %v3706_v27 = vmul.f32 0.5, %v3700_v18  ;;  %v4579_v18 = vld [vmem:[%s5170_s30] sm:$0xff]  }
0x1e8a   :  { %v3702_v21 = vpop.f32.mrf.mxu0  ;;  %v4140_v19 = vld [vmem:[%s5165_s29] ss:$0 sm:$0xff]  ;;  %s4914_s29 = scalar_lea.vmem %s3999_s20, 32 }
0x1e8b   :  { %4664 = verf.f32 %v3708_v20  ;;  %v3703_v2 = vadd.f32 %v4128_v16, %v3702_v21  ;;  %p4915_p4 = scmp.ne.s32.totalorder %s3999_s20, %s4914_s29  ;;  %p4920_p6 = scmp.lt.s32.totalorder %s4914_s29, %s4914_s29 }
0x1e8c   :  { %v4465_v22 = vpop.f32.mrf.mxu0 }
0x1e8d   :  { %v3709_v23 = vmul.f32 0.70710677, %v3703_v2  ;;  %v3707_v28 = vmul.f32 0.5, %v3703_v2  ;;  %p4921_p7 = por %p4920_p6, %p4919_p5 }
0x1e8f   :  { %4666 = verf.f32 %v3709_v23  ;;  %p4922_p8 = pnand %p4921_p7, %p4915_p4 }
0x1e98   :  { %v4665_v24 = vpop.eup %4664 }
0x1e99   :  { %v3712_v25 = vadd.f32 1.0, %v4665_v24 }
0x1e9b   :  { %v3714_v30 = vmul.f32 %v3712_v25, %v3706_v27 }
0x1e9c   :  { %v4667_v26 = vpop.eup %4666 }
0x1e9d   :  { %v3713_v29 = vadd.f32 1.0, %v4667_v26  ;;  %v4144_v26 = vld [vmem:[%s5175_s19] ss:$0 sm:$0xff] }
0x1e9f   :  { %v3715_v33 = vmul.f32 %v3713_v29, %v3707_v28 }
0x1ea1   :  { %v3716_v34 = vpack.c.bf16 %v3715_v33, %v3714_v30 }
0x1ea3   :  { %4475 = vmatmul.mubr.msk.bf16.vlgmr.msra.gmra.mxu1 %vm2013_vm6, %v3716_v34 }
0x1f63   :  { %v3793_v37 = vpop.f32.mrf.mxu1 }
0x1f64   :  { %v3794_v38 = vadd.f32 %v4132_v35, %v3793_v37 }
0x1f65   :  { %v4476_v40 = vpop.f32.mrf.mxu1 }
0x1f66   :  { %v3800_v31 = vadd.f32 %v3794_v38, %v3636_v5 }
0x1f67   :  { %v3796_v41 = vpop.f32.mrf.mxu1 }
0x1f68   :  { %v3797_v42 = vadd.f32 %v4132_v35, %v3796_v41  ;;  %v3804_v43 = vsel %vm279_vm0, %v3800_v31, 0.0 }
0x1f69   :  { %3805 = vadd.xlane.f32.xlu1 %v3804_v43  ;;  %v4477_v44 = vpop.f32.mrf.mxu1 }
0x1f6a   :  { %v3801_v32 = vadd.f32 %v3797_v42, %v3637_v9 }
0x1f6c   :  { %v3807_v45 = vsel %vm279_vm0, %v3801_v32, 0.0 }
0x1f6d   :  { %3808 = vadd.xlane.f32.xlu0 %v3807_v45 }
0x1ff2   :  { %v3806_v46 = vpop.xlane.xlu1 %3805 }
0x1ff3   :  { %v3810_v47 = vmul.f32 0.03125, %v3806_v46 }
0x1ff5   :  { %v3812_v48 = vsub.f32 %v3800_v31, %v3810_v47 }
0x1ff6   :  { %v3809_v49 = vpop.xlane.xlu0 %3808 }
0x1ff7   :  { %v3811_v50 = vmul.f32 0.03125, %v3809_v49  ;;  %v3814_v51 = vmul.f32 %v3812_v48, %v3812_v48 }
0x1ff9   :  { %v3813_v52 = vsub.f32 %v3801_v32, %v3811_v50  ;;  %v3816_v61 = vsel %vm279_vm0, %v3814_v51, 0.0 }
0x1ffa   :  { %3817 = vadd.xlane.f32.xlu1 %v3816_v61 }
0x1ffb   :  { %v3815_v54 = vmul.f32 %v3813_v52, %v3813_v52 }
0x1ffd   :  { %v3819_v55 = vsel %vm279_vm0, %v3815_v54, 0.0 }
0x1ffe   :  { %3820 = vadd.xlane.f32.xlu0 %v3819_v55 }
0x2083   :  { %v3818_v62 = vpop.xlane.xlu1 %3817 }
0x2084   :  { %v3822_v39 = vmul.f32 0.03125, %v3818_v62 }
0x2086   :  { %v3824_v59 = vadd.f32 1e-12, %v3822_v39 }
0x2087   :  { %v3821_v60 = vpop.xlane.xlu0 %3820 }
0x2088   :  { %4668 = vrsqrt.f32 %v3824_v59  ;;  %v3823_v63 = vmul.f32 0.03125, %v3821_v60 }
0x208a   :  { %v3825_v0 = vadd.f32 1e-12, %v3823_v63 }
0x208c   :  { %4670 = vrsqrt.f32 %v3825_v0 }
0x2095   :  { %v4669_v1 = vpop.eup %4668 }
0x2096   :  { %v3828_v53 = vmul.f32 %v4669_v1, %v3812_v48 }
0x2098   :  { %v3836_v4 = vmul.f32 %v4138_v3, %v3828_v53 }
0x2099   :  { %v4671_v6 = vpop.eup %4670 }
0x209a   :  { %v3829_v57 = vmul.f32 %v4671_v6, %v3813_v52  ;;  %v3844_v8 = vadd.f32 %v4139_v36, %v3836_v4 }
0x209c   :  { %v3837_v7 = vmul.f32 %v4138_v3, %v3829_v57  ;;  %v3846_v9 = vpack.c.bf16 %v3844_v8, %v3844_v8 }
0x209e   :  { %v3845_v5 = vadd.f32 %v4139_v36, %v3837_v7  ;;  %v3861_v12 = vunpack.c.l.b16 %v3846_v9 }
0x20a0   :  { %v3847_v10 = vpack.c.bf16 %v3845_v5, %v3845_v5 }
0x20a2   :  { %v3862_v11 = vunpack.c.l.b16 %v3847_v10 }
0x20a4   :  { %v3863_v13 = vrot.slane %v3862_v11, 7 }
0x20a6   :  { %v3865_v14 = vsel %vm3864_vm7, %v3863_v13, %v3861_v12 }
0x20a7   :  { %v3866_v16 = vpack.c.b16 %v3865_v14, %v3865_v14 }
0x20a9   :  { %4483 = vmatmul.mubr.msk.bf16.vlgmr.msra.gmra.mxu0 %vm279_vm0, %v3866_v16 }
0x20aa   :  { %4490 = vmatprep.mubr.msk.bf16.mxu0 %vm4995_vm1, %v4994_v15  ;;  %4487 = vmatpush3.bf16.msra.mxu0 %v4578_v17 }
0x20ab   :  { %4488 = vmatprep.subr.bf16.mxu0 %v4994_v15 }
0x20ae   :  { %4489 = vmatpush3.bf16.msra.mxu0 %v4579_v18 }
0x2169   :  { %v3916_v20 = vpop.f32.mrf.mxu0 }
0x216a   :  { %v3917_v21 = vadd.f32 %v4140_v19, %v3916_v20 }
0x216b   :  { %v4484_v2 = vpop.f32.mrf.mxu0 }
0x216c   :  { %4672 = vtanh.f32 %v3917_v21 }
0x216d   :  { %v3919_v22 = vpop.f32.mrf.mxu0 }
0x216f   :  { %v4485_v23 = vpop.f32.mrf.mxu0 }
0x2179   :  { %v4673_v24 = vpop.eup %4672 }
0x217a   :  { %v3923_v25 = vpack.c.bf16 %v4673_v24, %v4673_v24 }
0x217c   :  { %4491 = vmatmul.mubr.msk.bf16.vlgmr.msra.gmra.mxu0 %vm279_vm0, %v3923_v25 }
0x223c   :  { %v3984_v27 = vpop.f32.mrf.mxu0 }
0x223d   :  { %v3985_v28 = vadd.f32 %v4144_v26, %v3984_v27 }
0x223e   :  { %v4492_v15 = vpop.f32.mrf.mxu0 }
0x223f   :  { %3991 = vst.msk [vmem:[#allocation23] sm:$0x3] %vm3990_vm8, %v3985_v28 }
0x2240   :  { %v3987_v29 = vpop.f32.mrf.mxu0 }
0x2241   :  { %4925 = shalt.err (!%p4922_p8)
}
0x2242   :  { %4001 = dma.vmem_to_hbm [thread:$0]  %s3999_s20, 32, %s5180_s27, [#allocation5]   ;;  %v4493_v30 = vpop.f32.mrf.mxu0 }
0x2243   :  { %4948 = dma.done.wait [#allocation5], 32  }
0x2244   :  { %4949 = vsyncadd [#allocation5], 4294967264 }
0x2245   :  { %4005 = vsyncpa [#allocation4], 1 }
0x2246   :  { %4006 = vsyncpa [#allocation7], 1 }
0x2247   :  { %4007 = vsyncpa [#allocation10], 1 }
0x2248   :  { %4008 = vsyncpa [#allocation13], 1 }
0x2249   :  { %4009 = vsyncpa [#allocation16], 1 }
0x224a   :  { %4010 = vsyncpa [#allocation19], 1 }
0x224b   :  { %4011 = vsyncpa [#allocation22], 1 }
0x224c   :  { %4012 = vsyncpa [#allocation5], 1 }

</bundles_post_ra>
